<compile_context>
chip_gen: v7x
topology: tpu7x:2x2x1
jax: 0.10.0
libtpu: 0.0.40
codegen_flags: <defaults>
</compile_context>

<pallas_src>
import functools

import numpy as np

import jax
import jax.numpy as jnp
from jax.experimental import pallas as pl
from jax.experimental.pallas import tpu as pltpu


# ----------------------------------------------------------------------------
# Small helpers
# ----------------------------------------------------------------------------
def _round_up(x, m):
    return ((x + m - 1) // m) * m


def _vmem_limit_bytes():
    """Generation-aware VMEM limit (~80% of physical, capped)."""
    try:
        cap = int(pltpu.get_tpu_info().vmem_capacity_bytes)
    except Exception:
        cap = 64 * 1024 * 1024
    return max(32 * 1024 * 1024, min(int(cap * 0.8), 112 * 1024 * 1024))


def _reflect1(n):
    """Source indices (len n+2) of a 1-pixel ReflectionPad along a size-n axis."""
    idx = np.arange(-1, n + 1)
    idx = np.abs(idx)                      # -1 -> 1
    idx = np.where(idx > n - 1, 2 * (n - 1) - idx, idx)   # n -> n-2
    return idx


def _gather_index(h_in, w_in, upsample, src_stride, rneed):
    """Row-gather indices building the flattened reflection-padded input.

    Maps every row of the padded-domain flattened input (row = i*(w_in+2)+j over
    the 1-px-padded (h_in, w_in) image, optionally 2x-nearest-upsampled from the
    source) to a row of the previous flat activation (row = h*src_stride + w).
    Computed with numpy at trace time; tail rows (never used by valid outputs)
    point at row 0.
    """
    hi = _reflect1(h_in)
    wi = _reflect1(w_in)
    if upsample:
        hi, wi = hi // 2, wi // 2          # nearest 2x: out (i,j) <- in (i//2, j//2)
    rows = (hi[:, None] * src_stride + wi[None, :]).astype(np.int32).reshape(-1)
    out = np.zeros((rneed,), np.int32)
    out[: rows.size] = rows
    return jnp.asarray(out)


# ----------------------------------------------------------------------------
# Pallas conv3x3 kernels (padded-domain rows, lane-dense channels)
# ----------------------------------------------------------------------------
def _conv_kernel_taps(x_ref, w_ref, b_ref, o_ref, *, wp, tm, relu):
    """9-tap unrolled matmul (Cin >= 256: each tap already fills MXU K depth).

    x_ref: (Rneed, Cin)  flattened reflection-padded image
    w_ref: (9, Cin, tn)  taps for this Cout tile
    b_ref: (1, tn)       bias (f32)
    o_ref: (tm, tn)      padded-domain output rows [mi*tm, (mi+1)*tm)
    """
    base = pl.multiple_of(pl.program_id(2) * tm, 8)
    acc = jnp.zeros(o_ref.shape, jnp.float32)
    for t in range(9):
        off = (t // 3) * wp + (t % 3)      # tap (dh, dw) -> row shift dh*Wp + dw
        acc = acc + jnp.dot(x_ref[pl.ds(base + off, tm), :], w_ref[t],
                            preferred_element_type=jnp.float32)
    acc = acc + b_ref[...]
    if relu:
        acc = jnp.maximum(acc, 0.0)
    o_ref[...] = acc.astype(o_ref.dtype)


def _conv_kernel_fusedk(x_ref, w_ref, b_ref, o_ref, lhs_ref, *, wp, tm, cin, relu):
    """Long-K variant for Cin == 128: pack the 9 taps into one (tm, 9*Cin) LHS
    and issue a single K=9*Cin matmul (accumulation stays on the MXU)."""
    base = pl.multiple_of(pl.program_id(2) * tm, 8)
    for t in range(9):
        off = (t // 3) * wp + (t % 3)
        lhs_ref[:, t * cin:(t + 1) * cin] = x_ref[pl.ds(base + off, tm), :]
    acc = jnp.dot(lhs_ref[...], w_ref[...], preferred_element_type=jnp.float32)
    acc = acc + b_ref[...]
    if relu:
        acc = jnp.maximum(acc, 0.0)
    o_ref[...] = acc.astype(o_ref.dtype)


def _conv3x3_flat(xf, w, b, *, wp, tm, mout_pad, relu, compute_dtype, out_dtype):
    """3x3 conv on a flattened padded-domain image.

    xf: (B, Rneed, Cin)         Cin multiple of 128, Rneed multiple of 8
    w : (3, 3, Cin, Cout) f32   Cout multiple of 128
    b : (Cout,) f32
    Returns (B, mout_pad, Cout) in out_dtype (padded-domain rows).
    """
    B, rneed, cin = xf.shape
    cout = w.shape[-1]
    assert w.shape[2] == cin and cin % 128 == 0 and cout % 128 == 0
    tn = min(cout, 256)    # NOTE: on v5e, tn=128 for Cin>=256 layers if acc spills
    assert cout % tn == 0 and mout_pad % tm == 0 and rneed % 8 == 0

    xf = xf.astype(compute_dtype)
    bf = b.reshape(1, cout).astype(jnp.float32)

    fuse_k = cin <= 128
    if fuse_k:
        wf = w.reshape(9 * cin, cout).astype(compute_dtype)
        kernel = functools.partial(_conv_kernel_fusedk, wp=wp, tm=tm, cin=cin,
                                   relu=relu)
        w_spec = pl.BlockSpec((9 * cin, tn), lambda bi, ni, mi: (0, ni))
        scratch = [pltpu.VMEM((tm, 9 * cin), compute_dtype)]
    else:
        wf = w.reshape(9, cin, cout).astype(compute_dtype)
        kernel = functools.partial(_conv_kernel_taps, wp=wp, tm=tm, relu=relu)
        w_spec = pl.BlockSpec((9, cin, tn), lambda bi, ni, mi: (0, 0, ni))
        scratch = []

    isz = jnp.dtype(compute_dtype).itemsize
    osz = jnp.dtype(out_dtype).itemsize
    flops = 2 * B * mout_pad * 9 * cin * cout
    bytes_accessed = (B * rneed * cin * isz + wf.size * isz + cout * 4
                      + B * mout_pad * cout * osz)

    return pl.pallas_call(
        kernel,
        out_shape=jax.ShapeDtypeStruct((B, mout_pad, cout), out_dtype),
        grid_spec=pltpu.PrefetchScalarGridSpec(
            num_scalar_prefetch=0,
            # M-tile innermost: weight/bias blocks stay resident across the
            # whole M sweep; x is re-DMAed only on batch change.
            grid=(B, cout // tn, mout_pad // tm),
            in_specs=[
                pl.BlockSpec((None, rneed, cin), lambda bi, ni, mi: (bi, 0, 0)),
                w_spec,
                pl.BlockSpec((1, tn), lambda bi, ni, mi: (0, ni)),
            ],
            out_specs=pl.BlockSpec((None, tm, tn),
                                   lambda bi, ni, mi: (bi, mi, ni)),
            scratch_shapes=scratch,
        ),
        compiler_params=pltpu.CompilerParams(
            dimension_semantics=("parallel", "parallel", "parallel"),
            vmem_limit_bytes=_vmem_limit_bytes(),
        ),
        cost_estimate=pl.CostEstimate(flops=flops, transcendentals=0,
                                      bytes_accessed=bytes_accessed),
    )(xf, wf, bf)


# ----------------------------------------------------------------------------
# Decoder layer: (optional 2x upsample) + reflect-pad + conv3x3 (+ReLU),
# all spatial glue expressed as ONE row-gather feeding the Pallas conv.
# ----------------------------------------------------------------------------
def _decoder_layer(state, w, b, *, upsample, relu, compute_dtype,
                   out_dtype=None):
    flat, h, w_sp, stride = state          # flat: (B, Msrc, Cin_pad)
    h_in, w_in = (2 * h, 2 * w_sp) if upsample else (h, w_sp)
    cin, cout = w.shape[2], w.shape[3]
    cin_pad = flat.shape[-1]
    cout_pad = _round_up(cout, 128)
    assert cin <= cin_pad

    wp = w_in + 2
    mout = h_in * wp
    tm = 512 if mout >= 3072 else 256
    mout_pad = _round_up(mout, tm)
    rneed = _round_up(mout_pad + 2 * wp + 2, 8)

    # Fused upsample + reflect-pad + flatten + tail-pad: a single gather.
    idx = _gather_index(h_in, w_in, upsample, stride, rneed)
    xf = jnp.take(flat, idx, axis=1)                       # (B, rneed, cin_pad)

    # Zero-pad weights/bias to the lane-dense channel counts.
    wpad = jnp.zeros((3, 3, cin_pad, cout_pad), jnp.float32)
    wpad = wpad.at[:, :, :cin, :cout].set(w.astype(jnp.float32))
    bpad = jnp.zeros((cout_pad,), jnp.float32).at[:cout].set(b.astype(jnp.float32))

    y = _conv3x3_flat(xf, wpad, bpad, wp=wp, tm=tm, mout_pad=mout_pad,
                      relu=relu, compute_dtype=compute_dtype,
                      out_dtype=(out_dtype or compute_dtype))
    return (y, h_in, w_in, wp)


def conv3x3_reflect(x_nhwc, w, b, *, relu, upsample=False,
                    compute_dtype=jnp.bfloat16, out_dtype=None):
    """Standalone ReflectionPad2d(1)+Conv2d(3x3)(+ReLU) on NHWC (for testing)."""
    B, H, W, cin = x_nhwc.shape
    cin_pad = _round_up(cin, 128)
    flat = jnp.zeros((B, H * W, cin_pad), compute_dtype)
    flat = flat.at[:, :, :cin].set(x_nhwc.reshape(B, H * W, cin).astype(compute_dtype))
    y, h_o, w_o, stride = _decoder_layer(
        (flat, H, W, W), w, b, upsample=upsample, relu=relu,
        compute_dtype=compute_dtype, out_dtype=out_dtype)
    cout = w.shape[-1]
    return y[:, : h_o * stride, :].reshape(B, h_o, stride, -1)[:, :, :w_o, :cout]


# ----------------------------------------------------------------------------
# Parameters (deterministic synthetic init) and decoder forward
# ----------------------------------------------------------------------------
_PLAN = [
    ("d1", 512, 256), ("d2", 256, 256), ("d3", 256, 256), ("d4", 256, 256),
    ("d5", 256, 128), ("d6", 128, 128), ("d7", 128, 64), ("d8", 64, 64),
    ("d9", 64, 3),
]
_UPSAMPLE_BEFORE = {"d2", "d6", "d8"}


def init_params(key):
    params = {}
    keys = jax.random.split(key, len(_PLAN))
    for (name, cin, cout), k in zip(_PLAN, keys):
        wk, bk = jax.random.split(k)
        scale = jnp.sqrt(2.0 / (9 * cin))
        wgt = jax.random.normal(wk, (3, 3, cin, cout), jnp.float32) * scale
        bias = jax.random.normal(bk, (cout,), jnp.float32) * 0.01
        params[name] = (wgt, bias)
    return params


def vgg_decoder_forward(params, latent_nchw, *, compute_dtype=jnp.bfloat16):
    B, C, H, W = latent_nchw.shape
    flat = jnp.transpose(latent_nchw, (0, 2, 3, 1)).reshape(B, H * W, C)
    flat = flat.astype(compute_dtype)
    c_pad = _round_up(C, 128)
    if c_pad != C:
        flat = jnp.pad(flat, ((0, 0), (0, 0), (0, c_pad - C)))
    state = (flat, H, W, W)
    for i, (name, _, _) in enumerate(_PLAN):
        last = i == len(_PLAN) - 1
        state = _decoder_layer(
            state, *params[name],
            upsample=(name in _UPSAMPLE_BEFORE),
            relu=not last,
            compute_dtype=compute_dtype,
            out_dtype=(jnp.float32 if last else None))
    flat, h_f, w_f, stride = state
    img = flat[:, : h_f * stride, :].reshape(B, h_f, stride, -1)[:, :, :w_f, :3]
    return jnp.transpose(img, (0, 3, 1, 2))                # -> NCHW


# ----------------------------------------------------------------------------
# Pure-JAX reference (for correctness checks)
# ----------------------------------------------------------------------------
def _conv3x3_ref_nhwc(x, w, b, *, relu, compute_dtype, out_dtype=None):
    xp = jnp.pad(x.astype(compute_dtype), ((0, 0), (1, 1), (1, 1), (0, 0)),
                 mode="reflect")
    y = jax.lax.conv_general_dilated(
        xp, w.astype(compute_dtype), window_strides=(1, 1), padding="VALID",
        dimension_numbers=("NHWC", "HWIO", "NHWC"),
        preferred_element_type=jnp.float32)
    y = y + b.reshape(1, 1, 1, -1).astype(jnp.float32)
    if relu:
        y = jnp.maximum(y, 0.0)
    return y.astype(out_dtype or compute_dtype)


def vgg_decoder_reference(params, latent_nchw, *, compute_dtype=jnp.bfloat16):
    x = jnp.transpose(latent_nchw, (0, 2, 3, 1)).astype(compute_dtype)
    up = lambda z: jnp.repeat(jnp.repeat(z, 2, axis=1), 2, axis=2)
    for i, (name, _, _) in enumerate(_PLAN):
        if name in _UPSAMPLE_BEFORE:
            x = up(x)
        last = i == len(_PLAN) - 1
        x = _conv3x3_ref_nhwc(x, *params[name], relu=not last,
                              compute_dtype=compute_dtype,
                              out_dtype=(jnp.float32 if last else None))
    return jnp.transpose(x, (0, 3, 1, 2))


if __name__ == "__main__":
    key = jax.random.PRNGKey(0)
    pkey, xkey, skey = jax.random.split(key, 3)
    params = init_params(pkey)

    # --- single-layer f32 check: exercises reflect border, Cout padding (64->128)
    #     and the fused long-K path, with a tight-ish tolerance.
    ck = jax.random.split(skey, 3)
    xs = jax.random.normal(ck[0], (1, 6, 7, 128), jnp.float32)
    ws = jax.random.normal(ck[1], (3, 3, 128, 64), jnp.float32) * 0.05
    bs = jax.random.normal(ck[2], (64,), jnp.float32) * 0.01
    y_k = jax.block_until_ready(jax.jit(functools.partial(
        conv3x3_reflect, relu=True, compute_dtype=jnp.float32))(xs, ws, bs))
    y_r = _conv3x3_ref_nhwc(xs, ws, bs, relu=True, compute_dtype=jnp.float32)
    assert y_k.shape == y_r.shape, (y_k.shape, y_r.shape)
    assert bool(jnp.allclose(y_k, y_r, atol=2e-2, rtol=2e-2)), \
        float(jnp.max(jnp.abs(y_k - y_r)))

    # --- end-to-end decoder: latent (B, 512, h, w) -> image (B, 3, 8h, 8w)
    B, C, H, W = 2, 512, 8, 8
    latent = jax.random.normal(xkey, (B, C, H, W), jnp.float32)

    out = jax.block_until_ready(jax.jit(vgg_decoder_forward)(params, latent))
    assert out.shape == (B, 3, 8 * H, 8 * W), out.shape
    assert bool(jnp.all(jnp.isfinite(out)))

    ref = jax.block_until_ready(jax.jit(vgg_decoder_reference)(params, latent))
    assert bool(jnp.allclose(out, ref, atol=0.1, rtol=0.1)), \
        float(jnp.max(jnp.abs(out - ref)))

    print("KERNEL_OK")
</pallas_src>

<mosaic_0001>
module attributes {stable_mosaic.version = 11 : i64} {
  func.func @_conv_kernel_fusedk(%arg0: i32, %arg1: i32, %arg2: i32, %arg3: memref<1x280x128xf32, #tpu.memory_space<vmem>>, %arg4: memref<1152x128xf32, #tpu.memory_space<vmem>>, %arg5: memref<1x128xf32, #tpu.memory_space<vmem>>, %arg6: memref<1x256x128xf32, #tpu.memory_space<vmem>>, %arg7: memref<256x1152xf32, #tpu.memory_space<vmem>>) attributes {dimension_semantics = [#tpu.dimension_semantics<parallel>, #tpu.dimension_semantics<parallel>, #tpu.dimension_semantics<parallel>], iteration_bounds = array<i64: 1, 1, 1>, scalar_prefetch = 0 : i64, scratch_operands = 1 : i64, tpu.core_type = #tpu.core_type<tc>, window_params = [{transform_indices = @transform_0, window_bounds = array<i64: 1, 280, 128>}, {transform_indices = @transform_1, window_bounds = array<i64: 1152, 128>}, {transform_indices = @transform_2, window_bounds = array<i64: 1, 128>}, {transform_indices = @transform_3, window_bounds = array<i64: 1, 256, 128>}]} {
    %c256_i32 = arith.constant 256 : i32
    %0 = arith.muli %arg2, %c256_i32 : i32
    %1 = tpu.assume_multiple %0, 8 : i32
    %c0_i32 = arith.constant 0 : i32
    %2 = arith.addi %1, %c0_i32 : i32
    %c0 = arith.constant 0 : index
    %3 = arith.index_cast %2 : i32 to index
    %c0_0 = arith.constant 0 : index
    %4 = vector.load %arg3[%c0, %3, %c0_0] : memref<1x280x128xf32, #tpu.memory_space<vmem>>, vector<1x256x128xf32>
    %5 = vector.shape_cast %4 : vector<1x256x128xf32> to vector<256x128xf32>
    %c0_1 = arith.constant 0 : index
    %c0_2 = arith.constant 0 : index
    %6 = vector.load %arg7[%c0_1, %c0_2] : memref<256x1152xf32, #tpu.memory_space<vmem>>, vector<256x128xf32>
    tpu.vector_store %arg7[%c0_1, %c0_2], %5 {strides = array<i32>} : memref<256x1152xf32, #tpu.memory_space<vmem>>, vector<256x128xf32>,
    %c1_i32 = arith.constant 1 : i32
    %7 = arith.addi %1, %c1_i32 : i32
    %c0_3 = arith.constant 0 : index
    %8 = arith.index_cast %7 : i32 to index
    %c0_4 = arith.constant 0 : index
    %9 = vector.load %arg3[%c0_3, %8, %c0_4] : memref<1x280x128xf32, #tpu.memory_space<vmem>>, vector<1x256x128xf32>
    %10 = vector.shape_cast %9 : vector<1x256x128xf32> to vector<256x128xf32>
    %c0_5 = arith.constant 0 : index
    %c128 = arith.constant 128 : index
    %11 = vector.load %arg7[%c0_5, %c128] : memref<256x1152xf32, #tpu.memory_space<vmem>>, vector<256x128xf32>
    tpu.vector_store %arg7[%c0_5, %c128], %10 {strides = array<i32>} : memref<256x1152xf32, #tpu.memory_space<vmem>>, vector<256x128xf32>,
    %c2_i32 = arith.constant 2 : i32
    %12 = arith.addi %1, %c2_i32 : i32
    %c0_6 = arith.constant 0 : index
    %13 = arith.index_cast %12 : i32 to index
    %c0_7 = arith.constant 0 : index
    %14 = vector.load %arg3[%c0_6, %13, %c0_7] : memref<1x280x128xf32, #tpu.memory_space<vmem>>, vector<1x256x128xf32>
    %15 = vector.shape_cast %14 : vector<1x256x128xf32> to vector<256x128xf32>
    %c0_8 = arith.constant 0 : index
    %c256 = arith.constant 256 : index
    %16 = vector.load %arg7[%c0_8, %c256] : memref<256x1152xf32, #tpu.memory_space<vmem>>, vector<256x128xf32>
    tpu.vector_store %arg7[%c0_8, %c256], %15 {strides = array<i32>} : memref<256x1152xf32, #tpu.memory_space<vmem>>, vector<256x128xf32>,
    %c9_i32 = arith.constant 9 : i32
    %17 = arith.addi %1, %c9_i32 : i32
    %c0_9 = arith.constant 0 : index
    %18 = arith.index_cast %17 : i32 to index
    %c0_10 = arith.constant 0 : index
    %19 = vector.load %arg3[%c0_9, %18, %c0_10] : memref<1x280x128xf32, #tpu.memory_space<vmem>>, vector<1x256x128xf32>
    %20 = vector.shape_cast %19 : vector<1x256x128xf32> to vector<256x128xf32>
    %c0_11 = arith.constant 0 : index
    %c384 = arith.constant 384 : index
    %21 = vector.load %arg7[%c0_11, %c384] : memref<256x1152xf32, #tpu.memory_space<vmem>>, vector<256x128xf32>
    tpu.vector_store %arg7[%c0_11, %c384], %20 {strides = array<i32>} : memref<256x1152xf32, #tpu.memory_space<vmem>>, vector<256x128xf32>,
    %c10_i32 = arith.constant 10 : i32
    %22 = arith.addi %1, %c10_i32 : i32
    %c0_12 = arith.constant 0 : index
    %23 = arith.index_cast %22 : i32 to index
    %c0_13 = arith.constant 0 : index
    %24 = vector.load %arg3[%c0_12, %23, %c0_13] : memref<1x280x128xf32, #tpu.memory_space<vmem>>, vector<1x256x128xf32>
    %25 = vector.shape_cast %24 : vector<1x256x128xf32> to vector<256x128xf32>
    %c0_14 = arith.constant 0 : index
    %c512 = arith.constant 512 : index
    %26 = vector.load %arg7[%c0_14, %c512] : memref<256x1152xf32, #tpu.memory_space<vmem>>, vector<256x128xf32>
    tpu.vector_store %arg7[%c0_14, %c512], %25 {strides = array<i32>} : memref<256x1152xf32, #tpu.memory_space<vmem>>, vector<256x128xf32>,
    %c11_i32 = arith.constant 11 : i32
    %27 = arith.addi %1, %c11_i32 : i32
    %c0_15 = arith.constant 0 : index
    %28 = arith.index_cast %27 : i32 to index
    %c0_16 = arith.constant 0 : index
    %29 = vector.load %arg3[%c0_15, %28, %c0_16] : memref<1x280x128xf32, #tpu.memory_space<vmem>>, vector<1x256x128xf32>
    %30 = vector.shape_cast %29 : vector<1x256x128xf32> to vector<256x128xf32>
    %c0_17 = arith.constant 0 : index
    %c640 = arith.constant 640 : index
    %31 = vector.load %arg7[%c0_17, %c640] : memref<256x1152xf32, #tpu.memory_space<vmem>>, vector<256x128xf32>
    tpu.vector_store %arg7[%c0_17, %c640], %30 {strides = array<i32>} : memref<256x1152xf32, #tpu.memory_space<vmem>>, vector<256x128xf32>,
    %c18_i32 = arith.constant 18 : i32
    %32 = arith.addi %1, %c18_i32 : i32
    %c0_18 = arith.constant 0 : index
    %33 = arith.index_cast %32 : i32 to index
    %c0_19 = arith.constant 0 : index
    %34 = vector.load %arg3[%c0_18, %33, %c0_19] : memref<1x280x128xf32, #tpu.memory_space<vmem>>, vector<1x256x128xf32>
    %35 = vector.shape_cast %34 : vector<1x256x128xf32> to vector<256x128xf32>
    %c0_20 = arith.constant 0 : index
    %c768 = arith.constant 768 : index
    %36 = vector.load %arg7[%c0_20, %c768] : memref<256x1152xf32, #tpu.memory_space<vmem>>, vector<256x128xf32>
    tpu.vector_store %arg7[%c0_20, %c768], %35 {strides = array<i32>} : memref<256x1152xf32, #tpu.memory_space<vmem>>, vector<256x128xf32>,
    %c19_i32 = arith.constant 19 : i32
    %37 = arith.addi %1, %c19_i32 : i32
    %c0_21 = arith.constant 0 : index
    %38 = arith.index_cast %37 : i32 to index
    %c0_22 = arith.constant 0 : index
    %39 = vector.load %arg3[%c0_21, %38, %c0_22] : memref<1x280x128xf32, #tpu.memory_space<vmem>>, vector<1x256x128xf32>
    %40 = vector.shape_cast %39 : vector<1x256x128xf32> to vector<256x128xf32>
    %c0_23 = arith.constant 0 : index
    %c896 = arith.constant 896 : index
    %41 = vector.load %arg7[%c0_23, %c896] : memref<256x1152xf32, #tpu.memory_space<vmem>>, vector<256x128xf32>
    tpu.vector_store %arg7[%c0_23, %c896], %40 {strides = array<i32>} : memref<256x1152xf32, #tpu.memory_space<vmem>>, vector<256x128xf32>,
    %c20_i32 = arith.constant 20 : i32
    %42 = arith.addi %1, %c20_i32 : i32
    %c0_24 = arith.constant 0 : index
    %43 = arith.index_cast %42 : i32 to index
    %c0_25 = arith.constant 0 : index
    %44 = vector.load %arg3[%c0_24, %43, %c0_25] : memref<1x280x128xf32, #tpu.memory_space<vmem>>, vector<1x256x128xf32>
    %45 = vector.shape_cast %44 : vector<1x256x128xf32> to vector<256x128xf32>
    %c0_26 = arith.constant 0 : index
    %c1024 = arith.constant 1024 : index
    %46 = vector.load %arg7[%c0_26, %c1024] : memref<256x1152xf32, #tpu.memory_space<vmem>>, vector<256x128xf32>
    tpu.vector_store %arg7[%c0_26, %c1024], %45 {strides = array<i32>} : memref<256x1152xf32, #tpu.memory_space<vmem>>, vector<256x128xf32>,
    %c0_27 = arith.constant 0 : index
    %c0_28 = arith.constant 0 : index
    %47 = vector.load %arg7[%c0_27, %c0_28] : memref<256x1152xf32, #tpu.memory_space<vmem>>, vector<256x1152xf32>
    %c0_29 = arith.constant 0 : index
    %c0_30 = arith.constant 0 : index
    %48 = vector.load %arg4[%c0_29, %c0_30] : memref<1152x128xf32, #tpu.memory_space<vmem>>, vector<1152x128xf32>
    %cst = arith.constant dense<0.000000e+00> : vector<256x128xf32>
    %49 = tpu.matmul %47, %48, %cst {dimension_numbers = #tpu.dot_dimension_numbers<[1], [0], [0], [1], [0, 0, 1, 1], [], []>} : vector<256x1152xf32>, vector<1152x128xf32>, vector<256x128xf32> -> vector<256x128xf32>
    %c0_31 = arith.constant 0 : index
    %c0_32 = arith.constant 0 : index
    %50 = vector.load %arg5[%c0_31, %c0_32] : memref<1x128xf32, #tpu.memory_space<vmem>>, vector<1x128xf32>
    %51 = vector.broadcast %50 : vector<1x128xf32> to vector<256x128xf32>
    %52 = arith.addf %49, %51 : vector<256x128xf32>
    %cst_33 = arith.constant 0.000000e+00 : f32
    %53 = vector.broadcast %cst_33 : f32 to vector<256x128xf32>
    %54 = arith.maximumf %52, %53 : vector<256x128xf32>
    %c0_34 = arith.constant 0 : index
    %c0_35 = arith.constant 0 : index
    %c0_36 = arith.constant 0 : index
    %55 = vector.load %arg6[%c0_34, %c0_35, %c0_36] : memref<1x256x128xf32, #tpu.memory_space<vmem>>, vector<1x256x128xf32>
    %56 = vector.shape_cast %55 : vector<1x256x128xf32> to vector<256x128xf32>
    %57 = vector.shape_cast %54 : vector<256x128xf32> to vector<1x256x128xf32>
    tpu.vector_store %arg6[%c0_34, %c0_35, %c0_36], %57 {strides = array<i32>} : memref<1x256x128xf32, #tpu.memory_space<vmem>>, vector<1x256x128xf32>,
    return
  }
  func.func @transform_0(%arg0: i32, %arg1: i32, %arg2: i32) -> (i32, i32, i32) {
    %c0_i32 = arith.constant 0 : i32
    %c0_i32_0 = arith.constant 0 : i32
    %c0_i32_1 = arith.constant 0 : i32
    return %arg0, %c0_i32, %c0_i32_0 : i32, i32, i32
  }
  func.func @transform_1(%arg0: i32, %arg1: i32, %arg2: i32) -> (i32, i32) {
    %c0_i32 = arith.constant 0 : i32
    %c0_i32_0 = arith.constant 0 : i32
    return %c0_i32, %arg1 : i32, i32
  }
  func.func @transform_2(%arg0: i32, %arg1: i32, %arg2: i32) -> (i32, i32) {
    %c0_i32 = arith.constant 0 : i32
    %c0_i32_0 = arith.constant 0 : i32
    return %c0_i32, %arg1 : i32, i32
  }
  func.func @transform_3(%arg0: i32, %arg1: i32, %arg2: i32) -> (i32, i32, i32) {
    %c0_i32 = arith.constant 0 : i32
    return %arg0, %arg2, %arg1 : i32, i32, i32
  }
}

</mosaic_0001>

<bundles_post_ra>
// kernel: conv3x3_reflect.1
= control target key start
LH: loop header
LB: loop body
LE: loop exit
PB: predicated region body
PF: predicated region fallthrough
CT: control target
= control target key end

     0   :  { %v3058_v0 = vmov 0.0|0.0   ;;  %s4806_s1 = inlined_call_operand.vmem [shape: f32[1152,128], index: 1, kind: input, shape index: {}]   ;;  %s4807_s0 = inlined_call_operand.vmem [shape: f32[1,280,128], index: 0, kind: input, shape index: {}]   ;;  %s4808_s2 = inlined_call_operand.vmem [shape: f32[1,128], index: 2, kind: input, shape index: {}]   ;;  %s4809_s3 = inlined_call_operand.vmem [shape: f32[1,256,128], index: 3, kind: output, shape index: {}]  }
   0x1   :  { %2633 = vmatprep.subr.bf16.mxu1 %v3058_v0  ;;  %2681 = vmatprep.subr.bf16.mxu0 %v3058_v0  ;;  %v896_v1 = vld [vmem:[%s4806_s1] sm:$0xff]  ;;  %v897_v2 = vld [vmem:[%s4806_s1 + $0x8] sm:$0xff]  ;;  %v898_v6 = vld [vmem:[%s4806_s1 + $0x10] sm:$0xff] }
   0x2   :  { %v928_v3 = vld [vmem:[%s4806_s1 + $0x100] sm:$0xff]  ;;  %v2634_v4 = vpack.c.bf16 %v897_v2, %v896_v1  ;;  %v929_v5 = vld [vmem:[%s4806_s1 + $0x108] sm:$0xff]  ;;  %v899_v7 = vld [vmem:[%s4806_s1 + $0x18] sm:$0xff] }
   0x3   :  { %v2682_v8 = vpack.c.bf16 %v929_v5, %v928_v3  ;;  %v930_v9 = vld [vmem:[%s4806_s1 + $0x110] sm:$0xff]  ;;  %v931_v10 = vld [vmem:[%s4806_s1 + $0x118] sm:$0xff]  ;;  %v2637_v11 = vpack.c.bf16 %v899_v7, %v898_v6  ;;  %v900_v13 = vld [vmem:[%s4806_s1 + $0x20] sm:$0xff] }
   0x4   :  { %2635 = vmatpush1.bf16.msra.mxu1 %v2634_v4  ;;  %v2685_v12 = vpack.c.bf16 %v931_v10, %v930_v9  ;;  %v901_v14 = vld [vmem:[%s4806_s1 + $0x28] sm:$0xff]  ;;  %v932_v15 = vld [vmem:[%s4806_s1 + $0x120] sm:$0xff]  ;;  %v902_v19 = vld [vmem:[%s4806_s1 + $0x30] sm:$0xff] }
   0x5   :  { %2683 = vmatpush1.bf16.msra.mxu0 %v2682_v8  ;;  %2636 = vmatprep.subr.bf16.mxu1 %v3058_v0  ;;  %v933_v16 = vld [vmem:[%s4806_s1 + $0x128] sm:$0xff]  ;;  %v2640_v17 = vpack.c.bf16 %v901_v14, %v900_v13  ;;  %v903_v20 = vld [vmem:[%s4806_s1 + $0x38] sm:$0xff]  ;;  %v934_v21 = vld [vmem:[%s4806_s1 + $0x130] sm:$0xff] }
   0x6   :  { %2684 = vmatprep.subr.bf16.mxu0 %v3058_v0  ;;  %v2688_v18 = vpack.c.bf16 %v933_v16, %v932_v15  ;;  %v935_v22 = vld [vmem:[%s4806_s1 + $0x138] sm:$0xff]  ;;  %v2643_v23 = vpack.c.bf16 %v903_v20, %v902_v19  ;;  %v904_v25 = vld [vmem:[%s4806_s1 + $0x40] sm:$0xff]  ;;  %v905_v26 = vld [vmem:[%s4806_s1 + $0x48] sm:$0xff] }
   0x7   :  { %v2691_v24 = vpack.c.bf16 %v935_v22, %v934_v21  ;;  %v936_v27 = vld [vmem:[%s4806_s1 + $0x140] sm:$0xff]  ;;  %v937_v28 = vld [vmem:[%s4806_s1 + $0x148] sm:$0xff]  ;;  %v2646_v29 = vpack.c.bf16 %v905_v26, %v904_v25  ;;  %v906_v31 = vld [vmem:[%s4806_s1 + $0x50] sm:$0xff] }
   0x8   :  { %2638 = vmatpush1.bf16.msra.mxu1 %v2637_v11  ;;  %v2694_v30 = vpack.c.bf16 %v937_v28, %v936_v27  ;;  %v907_v32 = vld [vmem:[%s4806_s1 + $0x58] sm:$0xff]  ;;  %v938_v33 = vld [vmem:[%s4806_s1 + $0x150] sm:$0xff]  ;;  %v908_v37 = vld [vmem:[%s4806_s1 + $0x60] sm:$0xff] }
   0x9   :  { %2686 = vmatpush1.bf16.msra.mxu0 %v2685_v12  ;;  %2639 = vmatprep.subr.bf16.mxu1 %v3058_v0  ;;  %v939_v34 = vld [vmem:[%s4806_s1 + $0x158] sm:$0xff]  ;;  %v2649_v35 = vpack.c.bf16 %v907_v32, %v906_v31  ;;  %v909_v38 = vld [vmem:[%s4806_s1 + $0x68] sm:$0xff]  ;;  %v940_v39 = vld [vmem:[%s4806_s1 + $0x160] sm:$0xff] }
   0xa   :  { %2687 = vmatprep.subr.bf16.mxu0 %v3058_v0  ;;  %v2697_v36 = vpack.c.bf16 %v939_v34, %v938_v33  ;;  %v941_v40 = vld [vmem:[%s4806_s1 + $0x168] sm:$0xff]  ;;  %v2652_v43 = vpack.c.bf16 %v909_v38, %v908_v37  ;;  %v910_v45 = vld [vmem:[%s4806_s1 + $0x70] sm:$0xff]  ;;  %v911_v46 = vld [vmem:[%s4806_s1 + $0x78] sm:$0xff] }
   0xb   :  { %v2248_v41 = vld [vmem:[%s4807_s0 + $0x1] sm:$0xff]  ;;  %v3181_v42 = vld [vmem:[%s4807_s0 + $0x9] sm:$0xff]  ;;  %v2700_v44 = vpack.c.bf16 %v941_v40, %v940_v39  ;;  %v943_v48 = vld [vmem:[%s4806_s1 + $0x178] sm:$0xff]  ;;  %v2655_v49 = vpack.c.bf16 %v911_v46, %v910_v45 }
   0xc   :  { %2641 = vmatpush1.bf16.msra.mxu1 %v2640_v17  ;;  %1111 = vmatprep.mubr.f32.mxu1 %v2248_v41  ;;  %v942_v47 = vld [vmem:[%s4806_s1 + $0x170] sm:$0xff]  ;;  %v912_v51 = vld [vmem:[%s4806_s1 + $0x80] sm:$0xff]  ;;  %v913_v52 = vld [vmem:[%s4806_s1 + $0x88] sm:$0xff] }
   0xd   :  { %2689 = vmatpush1.bf16.msra.mxu0 %v2688_v18  ;;  %2642 = vmatprep.subr.bf16.mxu1 %v3058_v0  ;;  %v2703_v50 = vpack.c.bf16 %v943_v48, %v942_v47  ;;  %v944_v53 = vld [vmem:[%s4806_s1 + $0x180] sm:$0xff]  ;;  %v945_v54 = vld [vmem:[%s4806_s1 + $0x188] sm:$0xff]  ;;  %v2658_v55 = vpack.c.bf16 %v913_v52, %v912_v51  ;;  %v914_v57 = vld [vmem:[%s4806_s1 + $0x90] sm:$0xff] }
   0xe   :  { %2690 = vmatprep.subr.bf16.mxu0 %v3058_v0  ;;  %1336 = vmatprep.mubr.f32.mxu0 %v3181_v42  ;;  %v2706_v56 = vpack.c.bf16 %v945_v54, %v944_v53  ;;  %v915_v58 = vld [vmem:[%s4806_s1 + $0x98] sm:$0xff]  ;;  %v946_v59 = vld [vmem:[%s4806_s1 + $0x190] sm:$0xff]  ;;  %v916_v63 = vld [vmem:[%s4806_s1 + $0xa0] sm:$0xff] }
   0xf   :  { %v947_v60 = vld [vmem:[%s4806_s1 + $0x198] sm:$0xff]  ;;  %v2661_v61 = vpack.c.bf16 %v915_v58, %v914_v57  ;;  %v917_v1 = vld [vmem:[%s4806_s1 + $0xa8] sm:$0xff]  ;;  %v948_v2 = vld [vmem:[%s4806_s1 + $0x1a0] sm:$0xff] }
  0x10   :  { %2644 = vmatpush1.bf16.msra.mxu1 %v2643_v23  ;;  %v2709_v62 = vpack.c.bf16 %v947_v60, %v946_v59  ;;  %v949_v3 = vld [vmem:[%s4806_s1 + $0x1a8] sm:$0xff]  ;;  %v2664_v4 = vpack.c.bf16 %v917_v1, %v916_v63  ;;  %v918_v6 = vld [vmem:[%s4806_s1 + $0xb0] sm:$0xff]  ;;  %v919_v7 = vld [vmem:[%s4806_s1 + $0xb8] sm:$0xff] }
  0x11   :  { %2692 = vmatpush1.bf16.msra.mxu0 %v2691_v24  ;;  %2645 = vmatprep.subr.bf16.mxu1 %v3058_v0  ;;  %v2712_v5 = vpack.c.bf16 %v949_v3, %v948_v2  ;;  %v950_v8 = vld [vmem:[%s4806_s1 + $0x1b0] sm:$0xff]  ;;  %v951_v9 = vld [vmem:[%s4806_s1 + $0x1b8] sm:$0xff]  ;;  %v2667_v10 = vpack.c.bf16 %v919_v7, %v918_v6  ;;  %v920_v12 = vld [vmem:[%s4806_s1 + $0xc0] sm:$0xff] }
  0x12   :  { %2693 = vmatprep.subr.bf16.mxu0 %v3058_v0  ;;  %v2715_v11 = vpack.c.bf16 %v951_v9, %v950_v8  ;;  %v921_v13 = vld [vmem:[%s4806_s1 + $0xc8] sm:$0xff]  ;;  %v952_v14 = vld [vmem:[%s4806_s1 + $0x1c0] sm:$0xff]  ;;  %v922_v18 = vld [vmem:[%s4806_s1 + $0xd0] sm:$0xff] }
  0x13   :  { %v953_v15 = vld [vmem:[%s4806_s1 + $0x1c8] sm:$0xff]  ;;  %v2670_v16 = vpack.c.bf16 %v921_v13, %v920_v12  ;;  %v923_v19 = vld [vmem:[%s4806_s1 + $0xd8] sm:$0xff]  ;;  %v954_v20 = vld [vmem:[%s4806_s1 + $0x1d0] sm:$0xff] }
  0x14   :  { %2647 = vmatpush1.bf16.msra.mxu1 %v2646_v29  ;;  %v2718_v17 = vpack.c.bf16 %v953_v15, %v952_v14  ;;  %v955_v21 = vld [vmem:[%s4806_s1 + $0x1d8] sm:$0xff]  ;;  %v2673_v22 = vpack.c.bf16 %v923_v19, %v922_v18  ;;  %v924_v24 = vld [vmem:[%s4806_s1 + $0xe0] sm:$0xff]  ;;  %v925_v25 = vld [vmem:[%s4806_s1 + $0xe8] sm:$0xff] }
  0x15   :  { %2695 = vmatpush1.bf16.msra.mxu0 %v2694_v30  ;;  %2648 = vmatprep.subr.bf16.mxu1 %v3058_v0  ;;  %v2721_v23 = vpack.c.bf16 %v955_v21, %v954_v20  ;;  %v956_v26 = vld [vmem:[%s4806_s1 + $0x1e0] sm:$0xff]  ;;  %v957_v27 = vld [vmem:[%s4806_s1 + $0x1e8] sm:$0xff]  ;;  %v2676_v28 = vpack.c.bf16 %v925_v25, %v924_v24  ;;  %v926_v30 = vld [vmem:[%s4806_s1 + $0xf0] sm:$0xff] }
  0x16   :  { %2696 = vmatprep.subr.bf16.mxu0 %v3058_v0  ;;  %v2724_v29 = vpack.c.bf16 %v957_v27, %v956_v26  ;;  %v927_v31 = vld [vmem:[%s4806_s1 + $0xf8] sm:$0xff]  ;;  %v958_v32 = vld [vmem:[%s4806_s1 + $0x1f0] sm:$0xff]  ;;  %v993_v37 = vld [vmem:[%s4806_s1 + $0x308] sm:$0xff] }
  0x17   :  { %v959_v33 = vld [vmem:[%s4806_s1 + $0x1f8] sm:$0xff]  ;;  %v2679_v34 = vpack.c.bf16 %v927_v31, %v926_v30  ;;  %v960_v38 = vld [vmem:[%s4806_s1 + $0x200] sm:$0xff]  ;;  %v961_v39 = vld [vmem:[%s4806_s1 + $0x208] sm:$0xff] }
  0x18   :  { %2650 = vmatpush1.bf16.msra.mxu1 %v2649_v35  ;;  %v2727_v35 = vpack.c.bf16 %v959_v33, %v958_v32  ;;  %v16_v40 = vld [vmem:[%s4807_s0] sm:$0xff]  ;;  %v962_v45 = vld [vmem:[%s4806_s1 + $0x210] sm:$0xff]  ;;  %v963_v46 = vld [vmem:[%s4806_s1 + $0x218] sm:$0xff] }
  0x19   :  { %2698 = vmatpush1.bf16.msra.mxu0 %v2697_v36  ;;  %2651 = vmatprep.subr.bf16.mxu1 %v3058_v0  ;;  %v992_v36 = vld [vmem:[%s4806_s1 + $0x300] sm:$0xff]  ;;  %v2313_v47 = vld [vmem:[%s4807_s0 + $0x11] sm:$0xff]  ;;  %v2733_v52 = vpack.c.bf16 %v963_v46, %v962_v45  ;;  %v997_v57 = vld [vmem:[%s4806_s1 + $0x328] sm:$0xff] }
  0x1a   :  { %2699 = vmatprep.subr.bf16.mxu0 %v3058_v0  ;;  %v3327_v41 = vpack.c.bf16 %v993_v37, %v992_v36  ;;  %v994_v48 = vld [vmem:[%s4806_s1 + $0x310] sm:$0xff]  ;;  %v2314_v53 = vld [vmem:[%s4807_s0 + $0x19] sm:$0xff]  ;;  %v1001_v12 = vld [vmem:[%s4806_s1 + $0x348] sm:$0xff] }
  0x1b   :  { %v3357_v51 = vld [vmem:[%s4807_s0 + $0xa] sm:$0xff]  ;;  %v3385_v59 = vld [vmem:[%s4807_s0 + $0x12] sm:$0xff]  ;;  %v968_v9 = vld [vmem:[%s4806_s1 + $0x240] sm:$0xff] }
  0x1c   :  { %2653 = vmatpush1.bf16.msra.mxu1 %v2652_v43  ;;  %v2280_v43 = vld [vmem:[%s4807_s0 + $0x2] sm:$0xff]  ;;  %v18_v58 = vld [vmem:[%s4807_s0 + $0x10] sm:$0xff]  ;;  %v967_v1 = vld [vmem:[%s4806_s1 + $0x238] sm:$0xff] }
  0x1d   :  { %2701 = vmatpush1.bf16.msra.mxu0 %v2700_v44  ;;  %2654 = vmatprep.subr.bf16.mxu1 %v3058_v0  ;;  %v2730_v44 = vpack.c.bf16 %v961_v39, %v960_v38  ;;  %v966_v63 = vld [vmem:[%s4806_s1 + $0x230] sm:$0xff]  ;;  %v999_v3 = vld [vmem:[%s4806_s1 + $0x338] sm:$0xff]  ;;  %v20_v13 = vld [vmem:[%s4807_s0 + $0x20] sm:$0xff] }
  0x1e   :  { %2702 = vmatprep.subr.bf16.mxu0 %v3058_v0  ;;  %v998_v2 = vld [vmem:[%s4806_s1 + $0x330] sm:$0xff]  ;;  %v2739_v6 = vpack.c.bf16 %v967_v1, %v966_v63  ;;  %v3443_v14 = vld [vmem:[%s4807_s0 + $0x22] sm:$0xff]  ;;  %v971_v19 = vld [vmem:[%s4806_s1 + $0x258] sm:$0xff] }
  0x1f   :  { %v2316_v7 = vld [vmem:[%s4807_s0 + $0x29] sm:$0xff]  ;;  %v3421_v8 = vpack.c.bf16 %v999_v3, %v998_v2  ;;  %v1003_v21 = vld [vmem:[%s4806_s1 + $0x358] sm:$0xff]  ;;  %v972_v27 = vld [vmem:[%s4806_s1 + $0x260] sm:$0xff] }
  0x20   :  { %2656 = vmatpush1.bf16.msra.mxu1 %v2655_v49  ;;  %v995_v49 = vld [vmem:[%s4806_s1 + $0x318] sm:$0xff]  ;;  %v970_v18 = vld [vmem:[%s4806_s1 + $0x250] sm:$0xff]  ;;  %v1005_v30 = vld [vmem:[%s4806_s1 + $0x368] sm:$0xff] }
  0x21   :  { %2704 = vmatpush1.bf16.msra.mxu0 %v2703_v50  ;;  %2657 = vmatprep.subr.bf16.mxu1 %v3058_v0  ;;  %v17_v50 = vld [vmem:[%s4807_s0 + $0x8] sm:$0xff]  ;;  %v3363_v54 = vpack.c.bf16 %v995_v49, %v994_v48  ;;  %v1002_v20 = vld [vmem:[%s4806_s1 + $0x350] sm:$0xff]  ;;  %v2745_v24 = vpack.c.bf16 %v971_v19, %v970_v18  ;;  %v2318_v25 = vld [vmem:[%s4807_s0 + $0x39] sm:$0xff] }
  0x22   :  { %2705 = vmatprep.subr.bf16.mxu0 %v3058_v0  ;;  %v3479_v26 = vpack.c.bf16 %v1003_v21, %v1002_v20  ;;  %v22_v31 = vld [vmem:[%s4807_s0 + $0x30] sm:$0xff]  ;;  %v975_v37 = vld [vmem:[%s4806_s1 + $0x278] sm:$0xff]  ;;  %v977_v48 = vld [vmem:[%s4806_s1 + $0x288] sm:$0xff] }
  0x23   :  { %v3501_v32 = vld [vmem:[%s4807_s0 + $0x32] sm:$0xff]  ;;  %v2320_v45 = vld [vmem:[%s4807_s0 + $0x49] sm:$0xff]  ;;  %v1008_v49 = vld [vmem:[%s4806_s1 + $0x380] sm:$0xff] }
  0x24   :  { %2659 = vmatpush1.bf16.msra.mxu1 %v2658_v55  ;;  %v964_v55 = vld [vmem:[%s4806_s1 + $0x220] sm:$0xff]  ;;  %v974_v36 = vld [vmem:[%s4806_s1 + $0x270] sm:$0xff]  ;;  %v1007_v39 = vld [vmem:[%s4806_s1 + $0x378] sm:$0xff] }
  0x25   :  { %2707 = vmatpush1.bf16.msra.mxu0 %v2706_v56  ;;  %2660 = vmatprep.subr.bf16.mxu1 %v3058_v0  ;;  %v996_v56 = vld [vmem:[%s4806_s1 + $0x320] sm:$0xff]  ;;  %v1006_v38 = vld [vmem:[%s4806_s1 + $0x370] sm:$0xff]  ;;  %v25_v63 = vld [vmem:[%s4807_s0 + $0x48] sm:$0xff] }
  0x26   :  { %2708 = vmatprep.subr.bf16.mxu0 %v3058_v0  ;;  %v3537_v46 = vpack.c.bf16 %v1007_v39, %v1006_v38  ;;  %v3588_v1 = vld [vmem:[%s4807_s0 + $0x4a] sm:$0xff]  ;;  %v2322_v3 = vld [vmem:[%s4807_s0 + $0x59] sm:$0xff] }
  0x27   :  { %v982_v18 = vld [vmem:[%s4806_s1 + $0x2b0] sm:$0xff]  ;;  %v983_v19 = vld [vmem:[%s4806_s1 + $0x2b8] sm:$0xff] }
  0x28   :  { %2662 = vmatpush1.bf16.msra.mxu1 %v2661_v61  ;;  %v2315_v61 = vld [vmem:[%s4807_s0 + $0x21] sm:$0xff]  ;;  %v1014_v20 = vld [vmem:[%s4806_s1 + $0x3b0] sm:$0xff]  ;;  %v1015_v21 = vld [vmem:[%s4806_s1 + $0x3b8] sm:$0xff] }
  0x29   :  { %2710 = vmatpush1.bf16.msra.mxu0 %v2709_v62  ;;  %2663 = vmatprep.subr.bf16.mxu1 %v3058_v0  ;;  %v3392_v62 = vpack.c.bf16 %v997_v57, %v996_v56  ;;  %v978_v57 = vld [vmem:[%s4806_s1 + $0x290] sm:$0xff] }
  0x2a   :  { %2711 = vmatprep.subr.bf16.mxu0 %v3058_v0  ;;  %v2325_v38 = vld [vmem:[%s4807_s0 + $0x71] sm:$0xff] }
  0x2c   :  { %2665 = vmatpush1.bf16.msra.mxu1 %v2664_v4  ;;  %v19_v4 = vld [vmem:[%s4807_s0 + $0x18] sm:$0xff] }
  0x2d   :  { %2713 = vmatpush1.bf16.msra.mxu0 %v2712_v5  ;;  %2666 = vmatprep.subr.bf16.mxu1 %v3058_v0  ;;  %v3414_v5 = vld [vmem:[%s4807_s0 + $0x1a] sm:$0xff] }
  0x2e   :  { %2714 = vmatprep.subr.bf16.mxu0 %v3058_v0 }
  0x30   :  { %2668 = vmatpush1.bf16.msra.mxu1 %v2667_v10  ;;  %v969_v10 = vld [vmem:[%s4806_s1 + $0x248] sm:$0xff] }
  0x31   :  { %2716 = vmatpush1.bf16.msra.mxu0 %v2715_v11  ;;  %2669 = vmatprep.subr.bf16.mxu1 %v3058_v0  ;;  %v1000_v11 = vld [vmem:[%s4806_s1 + $0x340] sm:$0xff]  ;;  %v2742_v15 = vpack.c.bf16 %v969_v10, %v968_v9  ;;  %v1013_v10 = vld [vmem:[%s4806_s1 + $0x3a8] sm:$0xff] }
  0x32   :  { %2717 = vmatprep.subr.bf16.mxu0 %v3058_v0  ;;  %v1012_v9 = vld [vmem:[%s4806_s1 + $0x3a0] sm:$0xff] }
  0x34   :  { %2671 = vmatpush1.bf16.msra.mxu1 %v2670_v16  ;;  %v2317_v16 = vld [vmem:[%s4807_s0 + $0x31] sm:$0xff] }
  0x35   :  { %2719 = vmatpush1.bf16.msra.mxu0 %v2718_v17  ;;  %2672 = vmatprep.subr.bf16.mxu1 %v3058_v0  ;;  %v3450_v17 = vpack.c.bf16 %v1001_v12, %v1000_v11  ;;  %v26_v11 = vld [vmem:[%s4807_s0 + $0x50] sm:$0xff] }
  0x36   :  { %2720 = vmatprep.subr.bf16.mxu0 %v3058_v0  ;;  %v3617_v12 = vld [vmem:[%s4807_s0 + $0x52] sm:$0xff] }
  0x38   :  { %2674 = vmatpush1.bf16.msra.mxu1 %v2673_v22  ;;  %v21_v22 = vld [vmem:[%s4807_s0 + $0x28] sm:$0xff] }
  0x39   :  { %2722 = vmatpush1.bf16.msra.mxu0 %v2721_v23  ;;  %2675 = vmatprep.subr.bf16.mxu1 %v3058_v0  ;;  %v3472_v23 = vld [vmem:[%s4807_s0 + $0x2a] sm:$0xff] }
  0x3a   :  { %2723 = vmatprep.subr.bf16.mxu0 %v3058_v0 }
  0x3c   :  { %2677 = vmatpush1.bf16.msra.mxu1 %v2676_v28  ;;  %v973_v28 = vld [vmem:[%s4806_s1 + $0x268] sm:$0xff] }
  0x3d   :  { %2725 = vmatpush1.bf16.msra.mxu0 %v2724_v29  ;;  %2678 = vmatprep.subr.bf16.mxu1 %v3058_v0  ;;  %v1004_v29 = vld [vmem:[%s4806_s1 + $0x360] sm:$0xff]  ;;  %v2748_v33 = vpack.c.bf16 %v973_v28, %v972_v27  ;;  %v2324_v27 = vld [vmem:[%s4807_s0 + $0x69] sm:$0xff]  ;;  %v3653_v28 = vpack.c.bf16 %v1015_v21, %v1014_v20 }
  0x3e   :  { %2726 = vmatprep.subr.bf16.mxu0 %v3058_v0  ;;  %v2328_v21 = vld [vmem:[%s4807_s0 + $0x89] sm:$0xff] }
  0x40   :  { %2680 = vmatpush1.bf16.msra.mxu1 %v2679_v34  ;;  %v2319_v34 = vld [vmem:[%s4807_s0 + $0x41] sm:$0xff] }
  0x41   :  { %2728 = vmatpush1.bf16.msra.mxu0 %v2727_v35  ;;  %2857 = vmatprep.subr.bf16.mxu1 %v3058_v0  ;;  %v3508_v35 = vpack.c.bf16 %v1005_v30, %v1004_v29  ;;  %v984_v29 = vld [vmem:[%s4806_s1 + $0x2c0] sm:$0xff]  ;;  %v985_v30 = vld [vmem:[%s4806_s1 + $0x2c8] sm:$0xff] }
  0x42   :  { %2729 = vmatprep.subr.bf16.mxu0 %v3058_v0 }
  0x43   :  { %1112 = vmatmul.mubr.f32.vlgmr.msra.gmra.mrb[0].mxu1 %v16_v40  ;;  %v23_v40 = vld [vmem:[%s4807_s0 + $0x38] sm:$0xff] }
  0x44   :  { %1337 = vmatmul.mubr.f32.vlgmr.msra.gmra.mrb[0].mxu0 %v2280_v43  ;;  %2873 = vmatpush1.bf16.msra.mxu1 %v3327_v41  ;;  %v3530_v43 = vld [vmem:[%s4807_s0 + $0x3a] sm:$0xff] }
  0x45   :  { %2731 = vmatpush1.bf16.msra.mxu0 %v2730_v44  ;;  %1116 = vmatprep.mubr.f32.mxu1 %v3181_v42  ;;  %v965_v42 = vld [vmem:[%s4806_s1 + $0x228] sm:$0xff]  ;;  %v2751_v44 = vpack.c.bf16 %v975_v37, %v974_v36  ;;  %v2766_v37 = vpack.c.bf16 %v985_v30, %v984_v29  ;;  %v2329_v30 = vld [vmem:[%s4807_s0 + $0x91] sm:$0xff] }
  0x46   :  { %1341 = vmatprep.mubr.f32.mxu0 %v2313_v47  ;;  %2732 = vmatprep.subr.bf16.mxu0 %v3058_v0  ;;  %v2736_v60 = vpack.c.bf16 %v965_v42, %v964_v55  ;;  %v2321_v42 = vld [vmem:[%s4807_s0 + $0x51] sm:$0xff]  ;;  %v3675_v36 = vld [vmem:[%s4807_s0 + $0x62] sm:$0xff] }
  0x47   :  { %1117 = vmatmul.mubr.f32.gmra.mrb[2].mxu1 %v17_v50  ;;  %2858 = vmatprep.subr.bf16.mxu1 %v3058_v0  ;;  %v1009_v50 = vld [vmem:[%s4806_s1 + $0x388] sm:$0xff] }
  0x48   :  { %1342 = vmatmul.mubr.f32.gmra.mrb[2].mxu0 %v3357_v51  ;;  %1121 = vmatprep.mubr.f32.mxu1 %v2313_v47  ;;  %v976_v47 = vld [vmem:[%s4806_s1 + $0x280] sm:$0xff]  ;;  %v3566_v56 = vpack.c.bf16 %v1009_v50, %v1008_v49  ;;  %v3704_v49 = vld [vmem:[%s4807_s0 + $0x6a] sm:$0xff] }
  0x49   :  { %1346 = vmatprep.mubr.f32.mxu0 %v2314_v53  ;;  %2734 = vmatpush1.bf16.msra.mxu0 %v2733_v52  ;;  %v24_v52 = vld [vmem:[%s4807_s0 + $0x40] sm:$0xff]  ;;  %v2754_v55 = vpack.c.bf16 %v977_v48, %v976_v47  ;;  %v1019_v47 = vld [vmem:[%s4806_s1 + $0x3d8] sm:$0xff]  ;;  %v29_v48 = vld [vmem:[%s4807_s0 + $0x68] sm:$0xff] }
  0x4a   :  { %2874 = vmatpush1.bf16.msra.mxu1 %v3363_v54  ;;  %2735 = vmatprep.subr.bf16.mxu0 %v3058_v0  ;;  %v3787_v29 = vld [vmem:[%s4807_s0 + $0x82] sm:$0xff] }
  0x4b   :  { %1122 = vmatmul.mubr.f32.gmra.mrb[4].mxu1 %v18_v58  ;;  %2859 = vmatprep.subr.bf16.mxu1 %v3058_v0  ;;  %v979_v58 = vld [vmem:[%s4806_s1 + $0x298] sm:$0xff] }
  0x4c   :  { %1347 = vmatmul.mubr.f32.gmra.mrb[4].mxu0 %v3385_v59  ;;  %1126 = vmatprep.mubr.f32.mxu1 %v2314_v53  ;;  %v3559_v53 = vld [vmem:[%s4807_s0 + $0x42] sm:$0xff]  ;;  %v2757_v2 = vpack.c.bf16 %v979_v58, %v978_v57 }
  0x4d   :  { %1351 = vmatprep.mubr.f32.mxu0 %v2315_v61  ;;  %2737 = vmatpush1.bf16.msra.mxu0 %v2736_v60  ;;  %v1010_v60 = vld [vmem:[%s4806_s1 + $0x390] sm:$0xff]  ;;  %v989_v57 = vld [vmem:[%s4806_s1 + $0x2e8] sm:$0xff]  ;;  %v1020_v58 = vld [vmem:[%s4806_s1 + $0x3e0] sm:$0xff] }
  0x4e   :  { %2875 = vmatpush1.bf16.msra.mxu1 %v3392_v62  ;;  %2738 = vmatprep.subr.bf16.mxu0 %v3058_v0 }
  0x4f   :  { %1127 = vmatmul.mubr.f32.gmra.mrb[6].mxu1 %v19_v4  ;;  %2860 = vmatprep.subr.bf16.mxu1 %v3058_v0 }
  0x50   :  { %1352 = vmatmul.mubr.f32.gmra.mrb[6].mxu0 %v3414_v5  ;;  %1131 = vmatprep.mubr.f32.mxu1 %v2315_v61  ;;  %v1011_v61 = vld [vmem:[%s4806_s1 + $0x398] sm:$0xff] }
  0x51   :  { %1356 = vmatprep.mubr.f32.mxu0 %v2316_v7  ;;  %2740 = vmatpush1.bf16.msra.mxu0 %v2739_v6  ;;  %v3595_v4 = vpack.c.bf16 %v1011_v61, %v1010_v60  ;;  %v980_v6 = vld [vmem:[%s4806_s1 + $0x2a0] sm:$0xff]  ;;  %v1021_v60 = vld [vmem:[%s4806_s1 + $0x3e8] sm:$0xff]  ;;  %v30_v61 = vld [vmem:[%s4807_s0 + $0x70] sm:$0xff] }
  0x52   :  { %2876 = vmatpush1.bf16.msra.mxu1 %v3421_v8  ;;  %2741 = vmatprep.subr.bf16.mxu0 %v3058_v0 }
  0x53   :  { %1132 = vmatmul.mubr.f32.gmra.mrb[8].mxu1 %v20_v13  ;;  %2861 = vmatprep.subr.bf16.mxu1 %v3058_v0 }
  0x54   :  { %1357 = vmatmul.mubr.f32.gmra.mrb[8].mxu0 %v3443_v14  ;;  %1136 = vmatprep.mubr.f32.mxu1 %v2316_v7  ;;  %v981_v7 = vld [vmem:[%s4806_s1 + $0x2a8] sm:$0xff] }
  0x55   :  { %1361 = vmatprep.mubr.f32.mxu0 %v2317_v16  ;;  %2743 = vmatpush1.bf16.msra.mxu0 %v2742_v15  ;;  %v2760_v13 = vpack.c.bf16 %v981_v7, %v980_v6  ;;  %v2323_v15 = vld [vmem:[%s4807_s0 + $0x61] sm:$0xff]  ;;  %v3740_v6 = vpack.c.bf16 %v1021_v60, %v1020_v58  ;;  %v990_v7 = vld [vmem:[%s4806_s1 + $0x2f0] sm:$0xff]  ;;  %v2334_v58 = vld [vmem:[%s4807_s0 + $0xb9] sm:$0xff] }
  0x56   :  { %2877 = vmatpush1.bf16.msra.mxu1 %v3450_v17  ;;  %2744 = vmatprep.subr.bf16.mxu0 %v3058_v0  ;;  %v38_v60 = vld [vmem:[%s4807_s0 + $0xb0] sm:$0xff] }
  0x57   :  { %1137 = vmatmul.mubr.f32.gmra.mrb[10].mxu1 %v21_v22  ;;  %2862 = vmatprep.subr.bf16.mxu1 %v3058_v0  ;;  %v27_v22 = vld [vmem:[%s4807_s0 + $0x58] sm:$0xff] }
  0x58   :  { %1362 = vmatmul.mubr.f32.gmra.mrb[10].mxu0 %v3472_v23  ;;  %1141 = vmatprep.mubr.f32.mxu1 %v2317_v16  ;;  %v3624_v16 = vpack.c.bf16 %v1013_v10, %v1012_v9  ;;  %v991_v9 = vld [vmem:[%s4806_s1 + $0x2f8] sm:$0xff]  ;;  %v1022_v10 = vld [vmem:[%s4806_s1 + $0x3f0] sm:$0xff] }
  0x59   :  { %1366 = vmatprep.mubr.f32.mxu0 %v2318_v25  ;;  %2746 = vmatpush1.bf16.msra.mxu0 %v2745_v24  ;;  %v3646_v24 = vld [vmem:[%s4807_s0 + $0x5a] sm:$0xff]  ;;  %v2775_v20 = vpack.c.bf16 %v991_v9, %v990_v7  ;;  %v2336_v9 = vld [vmem:[%s4807_s0 + $0xc9] sm:$0xff] }
  0x5a   :  { %2878 = vmatpush1.bf16.msra.mxu1 %v3479_v26  ;;  %2747 = vmatprep.subr.bf16.mxu0 %v3058_v0  ;;  %v3874_v7 = vld [vmem:[%s4807_s0 + $0xba] sm:$0xff] }
  0x5b   :  { %1142 = vmatmul.mubr.f32.gmra.mrb[12].mxu1 %v22_v31  ;;  %2863 = vmatprep.subr.bf16.mxu1 %v3058_v0  ;;  %v1016_v31 = vld [vmem:[%s4806_s1 + $0x3c0] sm:$0xff] }
  0x5c   :  { %1367 = vmatmul.mubr.f32.gmra.mrb[12].mxu0 %v3501_v32  ;;  %1146 = vmatprep.mubr.f32.mxu1 %v2318_v25  ;;  %v2763_v25 = vpack.c.bf16 %v983_v19, %v982_v18  ;;  %v1025_v18 = vld [vmem:[%s4806_s1 + $0x408] sm:$0xff]  ;;  %v3768_v19 = vld [vmem:[%s4807_s0 + $0x7a] sm:$0xff] }
  0x5d   :  { %1371 = vmatprep.mubr.f32.mxu0 %v2319_v34  ;;  %2749 = vmatpush1.bf16.msra.mxu0 %v2748_v33  ;;  %v1017_v33 = vld [vmem:[%s4806_s1 + $0x3c8] sm:$0xff] }
  0x5e   :  { %2879 = vmatpush1.bf16.msra.mxu1 %v3508_v35  ;;  %2750 = vmatprep.subr.bf16.mxu0 %v3058_v0  ;;  %v3682_v39 = vpack.c.bf16 %v1017_v33, %v1016_v31  ;;  %v33_v31 = vld [vmem:[%s4807_s0 + $0x88] sm:$0xff] }
  0x5f   :  { %1147 = vmatmul.mubr.f32.gmra.mrb[14].mxu1 %v23_v40  ;;  %2864 = vmatprep.subr.bf16.mxu1 %v3058_v0  ;;  %v986_v40 = vld [vmem:[%s4806_s1 + $0x2d0] sm:$0xff] }
  0x60   :  { %1372 = vmatmul.mubr.f32.gmra.mrb[14].mxu0 %v3530_v43  ;;  %1151 = vmatprep.mubr.f32.mxu1 %v2319_v34  ;;  %v28_v34 = vld [vmem:[%s4807_s0 + $0x60] sm:$0xff]  ;;  %v3802_v33 = vld [vmem:[%s4807_s0 + $0x8a] sm:$0xff] }
  0x61   :  { %1376 = vmatprep.mubr.f32.mxu0 %v2320_v45  ;;  %2752 = vmatpush1.bf16.msra.mxu0 %v2751_v44  ;;  %v987_v44 = vld [vmem:[%s4806_s1 + $0x2d8] sm:$0xff] }
  0x62   :  { %2880 = vmatpush1.bf16.msra.mxu1 %v3537_v46  ;;  %2753 = vmatprep.subr.bf16.mxu0 %v3058_v0  ;;  %v2769_v50 = vpack.c.bf16 %v987_v44, %v986_v40  ;;  %v2331_v40 = vld [vmem:[%s4807_s0 + $0xa1] sm:$0xff]  ;;  %v35_v44 = vld [vmem:[%s4807_s0 + $0x98] sm:$0xff] }
  0x63   :  { %1152 = vmatmul.mubr.f32.gmra.mrb[16].mxu1 %v24_v52  ;;  %2865 = vmatprep.subr.bf16.mxu1 %v3058_v0  ;;  %v2326_v52 = vld [vmem:[%s4807_s0 + $0x79] sm:$0xff] }
  0x64   :  { %1377 = vmatmul.mubr.f32.gmra.mrb[16].mxu0 %v3559_v53  ;;  %1156 = vmatprep.mubr.f32.mxu1 %v2320_v45  ;;  %v1018_v45 = vld [vmem:[%s4806_s1 + $0x3d0] sm:$0xff] }
  0x65   :  { %1381 = vmatprep.mubr.f32.mxu0 %v2321_v42  ;;  %2755 = vmatpush1.bf16.msra.mxu0 %v2754_v55  ;;  %v3711_v55 = vpack.c.bf16 %v1019_v47, %v1018_v45  ;;  %v3826_v45 = vld [vmem:[%s4807_s0 + $0x9a] sm:$0xff]  ;;  %v2332_v47 = vld [vmem:[%s4807_s0 + $0xa9] sm:$0xff] }
  0x66   :  { %2881 = vmatpush1.bf16.msra.mxu1 %v3566_v56  ;;  %2756 = vmatprep.subr.bf16.mxu0 %v3058_v0 }
  0x67   :  { %1157 = vmatmul.mubr.f32.gmra.mrb[18].mxu1 %v25_v63  ;;  %2866 = vmatprep.subr.bf16.mxu1 %v3058_v0  ;;  %v3733_v63 = vld [vmem:[%s4807_s0 + $0x72] sm:$0xff] }
  0x68   :  { %1382 = vmatmul.mubr.f32.gmra.mrb[18].mxu0 %v3588_v1  ;;  %1161 = vmatprep.mubr.f32.mxu1 %v2321_v42  ;;  %v988_v42 = vld [vmem:[%s4806_s1 + $0x2e0] sm:$0xff] }
  0x69   :  { %1386 = vmatprep.mubr.f32.mxu0 %v2322_v3  ;;  %2758 = vmatpush1.bf16.msra.mxu0 %v2757_v2  ;;  %v2772_v2 = vpack.c.bf16 %v989_v57, %v988_v42  ;;  %v37_v42 = vld [vmem:[%s4807_s0 + $0xa8] sm:$0xff] }
  0x6a   :  { %2882 = vmatpush1.bf16.msra.mxu1 %v3595_v4  ;;  %2759 = vmatprep.subr.bf16.mxu0 %v3058_v0  ;;  %v3850_v57 = vld [vmem:[%s4807_s0 + $0xaa] sm:$0xff] }
  0x6b   :  { %1162 = vmatmul.mubr.f32.gmra.mrb[20].mxu1 %v26_v11  ;;  %2867 = vmatprep.subr.bf16.mxu1 %v3058_v0  ;;  %v1023_v11 = vld [vmem:[%s4806_s1 + $0x3f8] sm:$0xff] }
  0x6c   :  { %1387 = vmatmul.mubr.f32.gmra.mrb[20].mxu0 %v3617_v12  ;;  %1166 = vmatprep.mubr.f32.mxu1 %v2322_v3  ;;  %v2327_v3 = vld [vmem:[%s4807_s0 + $0x81] sm:$0xff] }
  0x6d   :  { %1391 = vmatprep.mubr.f32.mxu0 %v2323_v15  ;;  %2761 = vmatpush1.bf16.msra.mxu0 %v2760_v13  ;;  %v31_v13 = vld [vmem:[%s4807_s0 + $0x78] sm:$0xff] }
  0x6e   :  { %2883 = vmatpush1.bf16.msra.mxu1 %v3624_v16  ;;  %2762 = vmatprep.subr.bf16.mxu0 %v3058_v0 }
  0x6f   :  { %1167 = vmatmul.mubr.f32.gmra.mrb[22].mxu1 %v27_v22  ;;  %2868 = vmatprep.subr.bf16.mxu1 %v3058_v0  ;;  %v3775_v22 = vpack.c.bf16 %v1023_v11, %v1022_v10  ;;  %v40_v10 = vld [vmem:[%s4807_s0 + $0xc0] sm:$0xff] }
  0x70   :  { %1392 = vmatmul.mubr.f32.gmra.mrb[22].mxu0 %v3646_v24  ;;  %1171 = vmatprep.mubr.f32.mxu1 %v2323_v15  ;;  %v1024_v15 = vld [vmem:[%s4806_s1 + $0x400] sm:$0xff] }
  0x71   :  { %1396 = vmatprep.mubr.f32.mxu0 %v2324_v27  ;;  %2764 = vmatpush1.bf16.msra.mxu0 %v2763_v25  ;;  %v3778_v25 = vpack.c.bf16 %v1025_v18, %v1024_v15  ;;  %v3886_v11 = vld [vmem:[%s4807_s0 + $0xc2] sm:$0xff]  ;;  %v3898_v18 = vld [vmem:[%s4807_s0 + $0xca] sm:$0xff] }
  0x72   :  { %2884 = vmatpush1.bf16.msra.mxu1 %v3653_v28  ;;  %2765 = vmatprep.subr.bf16.mxu0 %v3058_v0  ;;  %v41_v15 = vld [vmem:[%s4807_s0 + $0xc8] sm:$0xff] }
  0x73   :  { %1172 = vmatmul.mubr.f32.gmra.mrb[24].mxu1 %v28_v34  ;;  %2869 = vmatprep.subr.bf16.mxu1 %v3058_v0  ;;  %v2330_v34 = vld [vmem:[%s4807_s0 + $0x99] sm:$0xff] }
  0x74   :  { %1397 = vmatmul.mubr.f32.gmra.mrb[24].mxu0 %v3675_v36  ;;  %1176 = vmatprep.mubr.f32.mxu1 %v2324_v27  ;;  %v32_v27 = vld [vmem:[%s4807_s0 + $0x80] sm:$0xff] }
  0x75   :  { %1401 = vmatprep.mubr.f32.mxu0 %v2325_v38  ;;  %2767 = vmatpush1.bf16.msra.mxu0 %v2766_v37  ;;  %v34_v37 = vld [vmem:[%s4807_s0 + $0x90] sm:$0xff] }
  0x76   :  { %2885 = vmatpush1.bf16.msra.mxu1 %v3682_v39  ;;  %2768 = vmatprep.subr.bf16.mxu0 %v3058_v0 }
  0x77   :  { %1177 = vmatmul.mubr.f32.gmra.mrb[26].mxu1 %v29_v48  ;;  %2870 = vmatprep.subr.bf16.mxu1 %v3058_v0  ;;  %v36_v48 = vld [vmem:[%s4807_s0 + $0xa0] sm:$0xff] }
  0x78   :  { %1402 = vmatmul.mubr.f32.gmra.mrb[26].mxu0 %v3704_v49  ;;  %1181 = vmatprep.mubr.f32.mxu1 %v2325_v38  ;;  %v3814_v38 = vld [vmem:[%s4807_s0 + $0x92] sm:$0xff] }
  0x79   :  { %1406 = vmatprep.mubr.f32.mxu0 %v2326_v52  ;;  %2770 = vmatpush1.bf16.msra.mxu0 %v2769_v50  ;;  %v3838_v50 = vld [vmem:[%s4807_s0 + $0xa2] sm:$0xff] }
  0x7a   :  { %2886 = vmatpush1.bf16.msra.mxu1 %v3711_v55  ;;  %2771 = vmatprep.subr.bf16.mxu0 %v3058_v0 }
  0x7b   :  { %1182 = vmatmul.mubr.f32.gmra.mrb[28].mxu1 %v30_v61  ;;  %2871 = vmatprep.subr.bf16.mxu1 %v3058_v0  ;;  %v3862_v61 = vld [vmem:[%s4807_s0 + $0xb2] sm:$0xff] }
  0x7c   :  { %1407 = vmatmul.mubr.f32.gmra.mrb[28].mxu0 %v3733_v63  ;;  %1186 = vmatprep.mubr.f32.mxu1 %v2326_v52  ;;  %v2333_v52 = vld [vmem:[%s4807_s0 + $0xb1] sm:$0xff] }
  0x7d   :  { %1411 = vmatprep.mubr.f32.mxu0 %v2327_v3  ;;  %2773 = vmatpush1.bf16.msra.mxu0 %v2772_v2  ;;  %v2335_v2 = vld [vmem:[%s4807_s0 + $0xc1] sm:$0xff] }
  0x7e   :  { %2887 = vmatpush1.bf16.msra.mxu1 %v3740_v6  ;;  %2774 = vmatprep.subr.bf16.mxu0 %v3058_v0 }
  0x7f   :  { %1187 = vmatmul.mubr.f32.gmra.mrb[30].mxu1 %v31_v13  ;;  %2872 = vmatprep.subr.bf16.mxu1 %v3058_v0  ;;  %v2337_v13 = vld [vmem:[%s4807_s0 + $0xd1] sm:$0xff] }
  0x80   :  { %1412 = vmatmul.mubr.f32.gmra.mrb[30].mxu0 %v3768_v19  ;;  %1191 = vmatprep.mubr.f32.mxu1 %v2327_v3  ;;  %v39_v3 = vld [vmem:[%s4807_s0 + $0xb8] sm:$0xff] }
  0x81   :  { %1416 = vmatprep.mubr.f32.mxu0 %v2328_v21  ;;  %2776 = vmatpush1.bf16.msra.mxu0 %v2775_v20  ;;  %v2338_v20 = vld [vmem:[%s4807_s0 + $0xd9] sm:$0xff] }
  0x82   :  { %2888 = vmatpush1.bf16.msra.mxu1 %v3775_v22  ;;  %2777 = vmatprep.subr.bf16.mxu0 %v3058_v0 }
  0x83   :  { %1192 = vmatmul.mubr.f32.gmra.mrb[32].mxu1 %v32_v27  ;;  %2826 = vmatprep.subr.bf16.mxu1 %v3778_v25  ;;  %v3910_v27 = vld [vmem:[%s4807_s0 + $0xd2] sm:$0xff] }
  0x84   :  { %1417 = vmatmul.mubr.f32.gmra.mrb[32].mxu0 %v3787_v29  ;;  %1196 = vmatprep.mubr.f32.mxu1 %v2328_v21  ;;  %v42_v21 = vld [vmem:[%s4807_s0 + $0xd0] sm:$0xff] }
  0x85   :  { %1421 = vmatprep.mubr.f32.mxu0 %v2329_v30 }
  0x87   :  { %1197 = vmatmul.mubr.f32.gmra.mrb[34].mxu1 %v33_v31  ;;  %v43_v31 = vld [vmem:[%s4807_s0 + $0xd8] sm:$0xff] }
  0x88   :  { %1422 = vmatmul.mubr.f32.gmra.mrb[34].mxu0 %v3802_v33  ;;  %1201 = vmatprep.mubr.f32.mxu1 %v2329_v30  ;;  %v2339_v30 = vld [vmem:[%s4807_s0 + $0xe1] sm:$0xff] }
  0x89   :  { %1426 = vmatprep.mubr.f32.mxu0 %v2330_v34 }
  0x8b   :  { %1202 = vmatmul.mubr.f32.gmra.mrb[36].mxu1 %v34_v37  ;;  %v2340_v37 = vld [vmem:[%s4807_s0 + $0xe9] sm:$0xff] }
  0x8c   :  { %1427 = vmatmul.mubr.f32.gmra.mrb[36].mxu0 %v3814_v38  ;;  %1206 = vmatprep.mubr.f32.mxu1 %v2330_v34  ;;  %v3922_v34 = vld [vmem:[%s4807_s0 + $0xda] sm:$0xff] }
  0x8d   :  { %1431 = vmatprep.mubr.f32.mxu0 %v2331_v40 }
  0x8f   :  { %1207 = vmatmul.mubr.f32.gmra.mrb[38].mxu1 %v35_v44  ;;  %v3934_v44 = vld [vmem:[%s4807_s0 + $0xe2] sm:$0xff] }
  0x90   :  { %1432 = vmatmul.mubr.f32.gmra.mrb[38].mxu0 %v3826_v45  ;;  %1211 = vmatprep.mubr.f32.mxu1 %v2331_v40  ;;  %v44_v40 = vld [vmem:[%s4807_s0 + $0xe0] sm:$0xff] }
  0x91   :  { %1436 = vmatprep.mubr.f32.mxu0 %v2332_v47 }
  0x93   :  { %1212 = vmatmul.mubr.f32.gmra.mrb[40].mxu1 %v36_v48  ;;  %v45_v48 = vld [vmem:[%s4807_s0 + $0xe8] sm:$0xff] }
  0x94   :  { %1437 = vmatmul.mubr.f32.gmra.mrb[40].mxu0 %v3838_v50  ;;  %1216 = vmatprep.mubr.f32.mxu1 %v2332_v47  ;;  %v2341_v47 = vld [vmem:[%s4807_s0 + $0xf1] sm:$0xff] }
  0x95   :  { %1441 = vmatprep.mubr.f32.mxu0 %v2333_v52 }
  0x97   :  { %1217 = vmatmul.mubr.f32.gmra.mrb[42].mxu1 %v37_v42  ;;  %v2342_v42 = vld [vmem:[%s4807_s0 + $0xf9] sm:$0xff] }
  0x98   :  { %1442 = vmatmul.mubr.f32.gmra.mrb[42].mxu0 %v3850_v57  ;;  %1221 = vmatprep.mubr.f32.mxu1 %v2333_v52  ;;  %v3946_v52 = vld [vmem:[%s4807_s0 + $0xea] sm:$0xff] }
  0x99   :  { %1446 = vmatprep.mubr.f32.mxu0 %v2334_v58 }
  0x9b   :  { %1222 = vmatmul.mubr.f32.gmra.mrb[44].mxu1 %v38_v60  ;;  %v3958_v60 = vld [vmem:[%s4807_s0 + $0xf2] sm:$0xff] }
  0x9c   :  { %1447 = vmatmul.mubr.f32.gmra.mrb[44].mxu0 %v3862_v61  ;;  %1226 = vmatprep.mubr.f32.mxu1 %v2334_v58  ;;  %v46_v58 = vld [vmem:[%s4807_s0 + $0xf0] sm:$0xff] }
  0x9d   :  { %1451 = vmatprep.mubr.f32.mxu0 %v2335_v2 }
  0x9f   :  { %1227 = vmatmul.mubr.f32.gmra.mrb[46].mxu1 %v39_v3  ;;  %v47_v3 = vld [vmem:[%s4807_s0 + $0xf8] sm:$0xff] }
  0xa0   :  { %1452 = vmatmul.mubr.f32.gmra.mrb[46].mxu0 %v3874_v7  ;;  %1231 = vmatprep.mubr.f32.mxu1 %v2335_v2  ;;  %v2343_v2 = vld [vmem:[%s4807_s0 + $0x101] sm:$0xff] }
  0xa1   :  { %1456 = vmatprep.mubr.f32.mxu0 %v2336_v9 }
  0xa3   :  { %1232 = vmatmul.mubr.f32.gmra.mrb[48].mxu1 %v40_v10  ;;  %v3975_v10 = vld [vmem:[%s4807_s0 + $0x53] sm:$0xff] }
  0xa4   :  { %1457 = vmatmul.mubr.f32.gmra.mrb[48].mxu0 %v3886_v11  ;;  %1236 = vmatprep.mubr.f32.mxu1 %v2336_v9  ;;  %v3970_v9 = vld [vmem:[%s4807_s0 + $0xfa] sm:$0xff] }
  0xa5   :  { %1461 = vmatprep.mubr.f32.mxu0 %v2337_v13 }
  0xa7   :  { %1237 = vmatmul.mubr.f32.gmra.mrb[50].mxu1 %v41_v15  ;;  %v1026_v15 = vld [vmem:[%s4806_s1 + $0x410] sm:$0xff] }
  0xa8   :  { %1462 = vmatmul.mubr.f32.gmra.mrb[50].mxu0 %v3898_v18  ;;  %1241 = vmatprep.mubr.f32.mxu1 %v2337_v13  ;;  %v2376_v13 = vld [vmem:[%s4807_s0 + $0xb] sm:$0xff] }
  0xa9   :  { %1466 = vmatprep.mubr.f32.mxu0 %v2338_v20 }
  0xab   :  { %1242 = vmatmul.mubr.f32.gmra.mrb[52].mxu1 %v42_v21  ;;  %v3991_v21 = vld [vmem:[%s4807_s0 + $0x13] sm:$0xff] }
  0xac   :  { %1467 = vmatmul.mubr.f32.gmra.mrb[52].mxu0 %v3910_v27  ;;  %1246 = vmatprep.mubr.f32.mxu1 %v2338_v20  ;;  %v1027_v20 = vld [vmem:[%s4806_s1 + $0x418] sm:$0xff] }
  0xad   :  { %1471 = vmatprep.mubr.f32.mxu0 %v2339_v30 }
  0xaf   :  { %1247 = vmatmul.mubr.f32.gmra.mrb[54].mxu1 %v43_v31  ;;  %v2829_v31 = vpack.c.bf16 %v1027_v20, %v1026_v15  ;;  %v1035_v15 = vld [vmem:[%s4806_s1 + $0x458] sm:$0xff] }
  0xb0   :  { %1472 = vmatmul.mubr.f32.gmra.mrb[54].mxu0 %v3922_v34  ;;  %1251 = vmatprep.mubr.f32.mxu1 %v2339_v30  ;;  %v3997_v30 = vld [vmem:[%s4807_s0 + $0x5b] sm:$0xff] }
  0xb1   :  { %1476 = vmatprep.mubr.f32.mxu0 %v2340_v37  ;;  %v4078_v20 = vld [vmem:[%s4807_s0 + $0x7b] sm:$0xff] }
  0xb3   :  { %1252 = vmatmul.mubr.f32.gmra.mrb[56].mxu1 %v44_v40  ;;  %v1029_v40 = vld [vmem:[%s4806_s1 + $0x428] sm:$0xff] }
  0xb4   :  { %1477 = vmatmul.mubr.f32.gmra.mrb[56].mxu0 %v3934_v44  ;;  %1256 = vmatprep.mubr.f32.mxu1 %v2340_v37  ;;  %v1028_v37 = vld [vmem:[%s4806_s1 + $0x420] sm:$0xff] }
  0xb5   :  { %1481 = vmatprep.mubr.f32.mxu0 %v2341_v47 }
  0xb7   :  { %1257 = vmatmul.mubr.f32.gmra.mrb[58].mxu1 %v45_v48  ;;  %v1031_v48 = vld [vmem:[%s4806_s1 + $0x438] sm:$0xff] }
  0xb8   :  { %1482 = vmatmul.mubr.f32.gmra.mrb[58].mxu0 %v3946_v52  ;;  %1261 = vmatprep.mubr.f32.mxu1 %v2341_v47  ;;  %v4012_v47 = vld [vmem:[%s4807_s0 + $0x63] sm:$0xff] }
  0xb9   :  { %1486 = vmatprep.mubr.f32.mxu0 %v2342_v42 }
  0xbb   :  { %1262 = vmatmul.mubr.f32.gmra.mrb[60].mxu1 %v46_v58 }
  0xbc   :  { %1487 = vmatmul.mubr.f32.gmra.mrb[60].mxu0 %v3958_v60  ;;  %1266 = vmatprep.mubr.f32.mxu1 %v2342_v42  ;;  %v4035_v42 = vld [vmem:[%s4807_s0 + $0x6b] sm:$0xff] }
  0xbd   :  { %1491 = vmatprep.mubr.f32.mxu0 %v2343_v2  ;;  %v1033_v2 = vld [vmem:[%s4806_s1 + $0x448] sm:$0xff] }
  0xbf   :  { %1267 = vmatmul.mubr.f32.gmra.mrb[62].mxu1 %v47_v3  ;;  %v4056_v3 = vld [vmem:[%s4807_s0 + $0x73] sm:$0xff] }
  0xc0   :  { %1492 = vmatmul.mubr.f32.gmra.mrb[62].mxu0 %v3970_v9  ;;  %1826 = vmatprep.mubr.f32.mxu1 %v3975_v10 }
  0xc1   :  { %1561 = vmatprep.mubr.f32.mxu0 %v2376_v13 }
  0xc3   :  { %1827 = vmatmul.mubr.f32.vlgmr.msra.gmra.mrb[64].mxu1 %v3617_v12 }
  0xc4   :  { %1562 = vmatmul.mubr.f32.vlgmr.msra.gmra.mrb[0].mxu0 %v3357_v51  ;;  %2828 = vmatpush3.bf16.msra.mxu1 %v3778_v25  ;;  %v4018_v51 = vld [vmem:[%s4807_s0 + $0x1b] sm:$0xff]  ;;  %v1030_v25 = vld [vmem:[%s4806_s1 + $0x430] sm:$0xff] }
  0xc5   :  { %2779 = vmatpush1.bf16.msra.mxu0 %v3327_v41  ;;  %1566 = vmatprep.mubr.f32.mxu0 %v3991_v21  ;;  %v2833_v41 = vpack.c.bf16 %v1029_v40, %v1028_v37  ;;  %v2837_v58 = vpack.c.bf16 %v1031_v48, %v1030_v25  ;;  %v1037_v37 = vld [vmem:[%s4806_s1 + $0x468] sm:$0xff]  ;;  %v1039_v25 = vld [vmem:[%s4806_s1 + $0x478] sm:$0xff] }
  0xc6   :  { %1831 = vmatprep.mubr.f32.mxu1 %v3997_v30  ;;  %2780 = vmatprep.subr.bf16.mxu0 %v3058_v0  ;;  %v4100_v40 = vld [vmem:[%s4807_s0 + $0x83] sm:$0xff]  ;;  %v4122_v48 = vld [vmem:[%s4807_s0 + $0x8b] sm:$0xff] }
  0xc7   :  { %1832 = vmatmul.mubr.f32.gmra.mrb[66].mxu1 %v3646_v24  ;;  %2830 = vmatprep.subr.bf16.mxu1 %v2829_v31 }
  0xc8   :  { %1567 = vmatmul.mubr.f32.gmra.mrb[2].mxu0 %v3385_v59  ;;  %1836 = vmatprep.mubr.f32.mxu1 %v4012_v47  ;;  %v4040_v59 = vld [vmem:[%s4807_s0 + $0x23] sm:$0xff] }
  0xc9   :  { %1571 = vmatprep.mubr.f32.mxu0 %v4018_v51  ;;  %2782 = vmatpush1.bf16.msra.mxu0 %v3363_v54  ;;  %v1032_v54 = vld [vmem:[%s4806_s1 + $0x440] sm:$0xff] }
  0xca   :  { %2832 = vmatpush3.bf16.msra.mxu1 %v2829_v31  ;;  %2783 = vmatprep.subr.bf16.mxu0 %v3058_v0  ;;  %v2841_v13 = vpack.c.bf16 %v1033_v2, %v1032_v54  ;;  %v4144_v54 = vld [vmem:[%s4807_s0 + $0x4b] sm:$0xff] }
  0xcb   :  { %1837 = vmatmul.mubr.f32.gmra.mrb[68].mxu1 %v3675_v36  ;;  %2834 = vmatprep.subr.bf16.mxu1 %v2833_v41 }
  0xcc   :  { %1572 = vmatmul.mubr.f32.gmra.mrb[4].mxu0 %v3414_v5  ;;  %1841 = vmatprep.mubr.f32.mxu1 %v4035_v42  ;;  %v4062_v5 = vld [vmem:[%s4807_s0 + $0x2b] sm:$0xff] }
  0xcd   :  { %1576 = vmatprep.mubr.f32.mxu0 %v4040_v59  ;;  %2785 = vmatpush1.bf16.msra.mxu0 %v3392_v62  ;;  %v1034_v62 = vld [vmem:[%s4806_s1 + $0x450] sm:$0xff] }
  0xce   :  { %2786 = vmatprep.subr.bf16.mxu0 %v3058_v0  ;;  %2836 = vmatpush3.bf16.msra.mxu1 %v2833_v41  ;;  %v2845_v31 = vpack.c.bf16 %v1035_v15, %v1034_v62 }
  0xcf   :  { %1842 = vmatmul.mubr.f32.gmra.mrb[70].mxu1 %v3704_v49  ;;  %2838 = vmatprep.subr.bf16.mxu1 %v2837_v58 }
  0xd0   :  { %1577 = vmatmul.mubr.f32.gmra.mrb[6].mxu0 %v3443_v14  ;;  %1846 = vmatprep.mubr.f32.mxu1 %v4056_v3  ;;  %v4084_v14 = vld [vmem:[%s4807_s0 + $0x33] sm:$0xff] }
  0xd1   :  { %1581 = vmatprep.mubr.f32.mxu0 %v4062_v5  ;;  %2788 = vmatpush1.bf16.msra.mxu0 %v3421_v8  ;;  %v1036_v8 = vld [vmem:[%s4806_s1 + $0x460] sm:$0xff] }
  0xd2   :  { %2789 = vmatprep.subr.bf16.mxu0 %v3058_v0  ;;  %2840 = vmatpush3.bf16.msra.mxu1 %v2837_v58  ;;  %v2849_v41 = vpack.c.bf16 %v1037_v37, %v1036_v8  ;;  %v2484_v37 = vld [vmem:[%s4807_s0 + $0x74] sm:$0xff] }
  0xd3   :  { %1847 = vmatmul.mubr.f32.gmra.mrb[72].mxu1 %v3733_v63  ;;  %2842 = vmatprep.subr.bf16.mxu1 %v2841_v13 }
  0xd4   :  { %1582 = vmatmul.mubr.f32.gmra.mrb[8].mxu0 %v3472_v23  ;;  %1851 = vmatprep.mubr.f32.mxu1 %v4078_v20  ;;  %v4106_v23 = vld [vmem:[%s4807_s0 + $0x3b] sm:$0xff] }
  0xd5   :  { %1586 = vmatprep.mubr.f32.mxu0 %v4084_v14  ;;  %2791 = vmatpush1.bf16.msra.mxu0 %v3450_v17  ;;  %v1038_v17 = vld [vmem:[%s4806_s1 + $0x470] sm:$0xff] }
  0xd6   :  { %2792 = vmatprep.subr.bf16.mxu0 %v3058_v0  ;;  %2844 = vmatpush3.bf16.msra.mxu1 %v2841_v13  ;;  %v2853_v58 = vpack.c.bf16 %v1039_v25, %v1038_v17  ;;  %v2480_v13 = vld [vmem:[%s4807_s0 + $0x54] sm:$0xff]  ;;  %v2486_v17 = vld [vmem:[%s4807_s0 + $0x84] sm:$0xff] }
  0xd7   :  { %1852 = vmatmul.mubr.f32.gmra.mrb[74].mxu1 %v3768_v19  ;;  %2846 = vmatprep.subr.bf16.mxu1 %v2845_v31 }
  0xd8   :  { %1587 = vmatmul.mubr.f32.gmra.mrb[10].mxu0 %v3501_v32  ;;  %1856 = vmatprep.mubr.f32.mxu1 %v4100_v40  ;;  %v4128_v32 = vld [vmem:[%s4807_s0 + $0x43] sm:$0xff] }
  0xd9   :  { %1591 = vmatprep.mubr.f32.mxu0 %v4106_v23  ;;  %2794 = vmatpush1.bf16.msra.mxu0 %v3479_v26  ;;  %v4138_v26 = vld [vmem:[%s4807_s0 + $0x93] sm:$0xff] }
  0xda   :  { %2795 = vmatprep.subr.bf16.mxu0 %v3058_v0  ;;  %2848 = vmatpush3.bf16.msra.mxu1 %v2845_v31 }
  0xdb   :  { %1857 = vmatmul.mubr.f32.gmra.mrb[76].mxu1 %v3787_v29  ;;  %2850 = vmatprep.subr.bf16.mxu1 %v2849_v41 }
  0xdc   :  { %1592 = vmatmul.mubr.f32.gmra.mrb[12].mxu0 %v3530_v43  ;;  %1861 = vmatprep.mubr.f32.mxu1 %v4122_v48  ;;  %v4165_v43 = vld [vmem:[%s4807_s0 + $0xa3] sm:$0xff] }
  0xdd   :  { %1596 = vmatprep.mubr.f32.mxu0 %v4128_v32  ;;  %2797 = vmatpush1.bf16.msra.mxu0 %v3508_v35  ;;  %v4154_v35 = vld [vmem:[%s4807_s0 + $0x9b] sm:$0xff] }
  0xde   :  { %2798 = vmatprep.subr.bf16.mxu0 %v3058_v0  ;;  %2852 = vmatpush3.bf16.msra.mxu1 %v2849_v41 }
  0xdf   :  { %1862 = vmatmul.mubr.f32.gmra.mrb[78].mxu1 %v3802_v33  ;;  %2854 = vmatprep.subr.bf16.mxu1 %v2853_v58 }
  0xe0   :  { %1597 = vmatmul.mubr.f32.gmra.mrb[14].mxu0 %v3559_v53  ;;  %1866 = vmatprep.mubr.f32.mxu1 %v4138_v26  ;;  %v2460_v53 = vld [vmem:[%s4807_s0 + $0xb3] sm:$0xff] }
  0xe1   :  { %1601 = vmatprep.mubr.f32.mxu0 %v4144_v54  ;;  %2800 = vmatpush1.bf16.msra.mxu0 %v3537_v46  ;;  %v2459_v46 = vld [vmem:[%s4807_s0 + $0xab] sm:$0xff] }
  0xe2   :  { %2801 = vmatprep.subr.bf16.mxu0 %v3058_v0  ;;  %2856 = vmatpush3.bf16.msra.mxu1 %v2853_v58  ;;  %v2488_v58 = vld [vmem:[%s4807_s0 + $0x94] sm:$0xff] }
  0xe3   :  { %1867 = vmatmul.mubr.f32.gmra.mrb[80].mxu1 %v3814_v38 }
  0xe4   :  { %1602 = vmatmul.mubr.f32.gmra.mrb[16].mxu0 %v3588_v1  ;;  %1871 = vmatprep.mubr.f32.mxu1 %v4154_v35  ;;  %v2462_v1 = vld [vmem:[%s4807_s0 + $0xc3] sm:$0xff] }
  0xe5   :  { %1606 = vmatprep.mubr.f32.mxu0 %v3975_v10  ;;  %2803 = vmatpush1.bf16.msra.mxu0 %v3566_v56  ;;  %v2461_v56 = vld [vmem:[%s4807_s0 + $0xbb] sm:$0xff] }
  0xe6   :  { %2804 = vmatprep.subr.bf16.mxu0 %v3058_v0  ;;  %v2476_v10 = vld [vmem:[%s4807_s0 + $0x34] sm:$0xff] }
  0xe7   :  { %1872 = vmatmul.mubr.f32.gmra.mrb[82].mxu1 %v3826_v45 }
  0xe8   :  { %1607 = vmatmul.mubr.f32.gmra.mrb[18].mxu0 %v3617_v12  ;;  %1876 = vmatprep.mubr.f32.mxu1 %v4165_v43  ;;  %v4216_v12 = vld [vmem:[%s4807_s0 + $0xd3] sm:$0xff] }
  0xe9   :  { %1611 = vmatprep.mubr.f32.mxu0 %v3997_v30  ;;  %2806 = vmatpush1.bf16.msra.mxu0 %v3595_v4  ;;  %v2463_v4 = vld [vmem:[%s4807_s0 + $0xcb] sm:$0xff] }
  0xea   :  { %2807 = vmatprep.subr.bf16.mxu0 %v3058_v0 }
  0xeb   :  { %1877 = vmatmul.mubr.f32.gmra.mrb[84].mxu1 %v3838_v50 }
  0xec   :  { %1612 = vmatmul.mubr.f32.gmra.mrb[20].mxu0 %v3646_v24  ;;  %1881 = vmatprep.mubr.f32.mxu1 %v2459_v46  ;;  %v4246_v24 = vld [vmem:[%s4807_s0 + $0xeb] sm:$0xff] }
  0xed   :  { %1616 = vmatprep.mubr.f32.mxu0 %v4012_v47  ;;  %2809 = vmatpush1.bf16.msra.mxu0 %v3624_v16  ;;  %v4227_v16 = vld [vmem:[%s4807_s0 + $0xdb] sm:$0xff] }
  0xee   :  { %2810 = vmatprep.subr.bf16.mxu0 %v3058_v0 }
  0xef   :  { %1882 = vmatmul.mubr.f32.gmra.mrb[86].mxu1 %v3850_v57 }
  0xf0   :  { %1617 = vmatmul.mubr.f32.gmra.mrb[22].mxu0 %v3675_v36  ;;  %1886 = vmatprep.mubr.f32.mxu1 %v2460_v53  ;;  %v4263_v36 = vld [vmem:[%s4807_s0 + $0xfb] sm:$0xff] }
  0xf1   :  { %1621 = vmatprep.mubr.f32.mxu0 %v4035_v42  ;;  %2812 = vmatpush1.bf16.msra.mxu0 %v3653_v28  ;;  %v4255_v28 = vld [vmem:[%s4807_s0 + $0xf3] sm:$0xff]  ;;  %v2478_v42 = vld [vmem:[%s4807_s0 + $0x44] sm:$0xff] }
  0xf2   :  { %2813 = vmatprep.subr.bf16.mxu0 %v3058_v0 }
  0xf3   :  { %1887 = vmatmul.mubr.f32.gmra.mrb[88].mxu1 %v3862_v61 }
  0xf4   :  { %1622 = vmatmul.mubr.f32.gmra.mrb[24].mxu0 %v3704_v49  ;;  %1891 = vmatprep.mubr.f32.mxu1 %v2461_v56 }
  0xf5   :  { %1626 = vmatprep.mubr.f32.mxu0 %v4056_v3  ;;  %2815 = vmatpush1.bf16.msra.mxu0 %v3682_v39  ;;  %v4271_v39 = vld [vmem:[%s4807_s0 + $0x103] sm:$0xff] }
  0xf6   :  { %2816 = vmatprep.subr.bf16.mxu0 %v3058_v0 }
  0xf7   :  { %1892 = vmatmul.mubr.f32.gmra.mrb[90].mxu1 %v3874_v7 }
  0xf8   :  { %1627 = vmatmul.mubr.f32.gmra.mrb[26].mxu0 %v3733_v63  ;;  %1896 = vmatprep.mubr.f32.mxu1 %v2462_v1  ;;  %v4281_v63 = vld [vmem:[%s4807_s0 + $0x102] sm:$0xff] }
  0xf9   :  { %1631 = vmatprep.mubr.f32.mxu0 %v4078_v20  ;;  %2818 = vmatpush1.bf16.msra.mxu0 %v3711_v55  ;;  %v2482_v20 = vld [vmem:[%s4807_s0 + $0x64] sm:$0xff] }
  0xfa   :  { %2819 = vmatprep.subr.bf16.mxu0 %v3058_v0 }
  0xfb   :  { %1897 = vmatmul.mubr.f32.gmra.mrb[92].mxu1 %v3886_v11 }
  0xfc   :  { %1632 = vmatmul.mubr.f32.gmra.mrb[28].mxu0 %v3768_v19  ;;  %1901 = vmatprep.mubr.f32.mxu1 %v2463_v4 }
  0xfd   :  { %1636 = vmatprep.mubr.f32.mxu0 %v4100_v40  ;;  %2821 = vmatpush1.bf16.msra.mxu0 %v3740_v6  ;;  %v2471_v6 = vld [vmem:[%s4807_s0 + $0x10b] sm:$0xff] }
  0xfe   :  { %2822 = vmatprep.subr.bf16.mxu0 %v3058_v0  ;;  %v4237_v0 = vld [vmem:[%s4807_s0 + $0xe3] sm:$0xff] }
  0xff   :  { %1902 = vmatmul.mubr.f32.gmra.mrb[94].mxu1 %v3898_v18 }
 0x100   :  { %1637 = vmatmul.mubr.f32.gmra.mrb[30].mxu0 %v3787_v29  ;;  %1906 = vmatprep.mubr.f32.mxu1 %v4216_v12  ;;  %v2439_v29 = vld [vmem:[%s4807_s0 + $0x10a] sm:$0xff] }
 0x101   :  { %1641 = vmatprep.mubr.f32.mxu0 %v4122_v48  ;;  %2824 = vmatpush1.bf16.msra.mxu0 %v3775_v22 }
 0x103   :  { %1907 = vmatmul.mubr.f32.gmra.mrb[96].mxu1 %v3910_v27 }
 0x104   :  { %1642 = vmatmul.mubr.f32.gmra.mrb[32].mxu0 %v3802_v33  ;;  %1911 = vmatprep.mubr.f32.mxu1 %v4227_v16  ;;  %v2472_v33 = vld [vmem:[%s4807_s0 + $0x14] sm:$0xff] }
 0x105   :  { %1646 = vmatprep.mubr.f32.mxu0 %v4138_v26 }
 0x107   :  { %1912 = vmatmul.mubr.f32.gmra.mrb[98].mxu1 %v3922_v34 }
 0x108   :  { %1647 = vmatmul.mubr.f32.gmra.mrb[34].mxu0 %v3814_v38  ;;  %1916 = vmatprep.mubr.f32.mxu1 %v4237_v0 }
 0x109   :  { %1651 = vmatprep.mubr.f32.mxu0 %v4154_v35 }
 0x10b   :  { %1917 = vmatmul.mubr.f32.gmra.mrb[100].mxu1 %v3934_v44 }
 0x10c   :  { %1652 = vmatmul.mubr.f32.gmra.mrb[36].mxu0 %v3826_v45  ;;  %1921 = vmatprep.mubr.f32.mxu1 %v4246_v24 }
 0x10d   :  { %1656 = vmatprep.mubr.f32.mxu0 %v4165_v43  ;;  %v2408_v43 = vld [vmem:[%s4807_s0 + $0x12] sm:$0xff] }
 0x10f   :  { %1922 = vmatmul.mubr.f32.gmra.mrb[102].mxu1 %v3946_v52 }
 0x110   :  { %1657 = vmatmul.mubr.f32.gmra.mrb[38].mxu0 %v3838_v50  ;;  %1926 = vmatprep.mubr.f32.mxu1 %v4255_v28  ;;  %v2473_v50 = vld [vmem:[%s4807_s0 + $0x1c] sm:$0xff] }
 0x111   :  { %1661 = vmatprep.mubr.f32.mxu0 %v2459_v46  ;;  %v2490_v46 = vld [vmem:[%s4807_s0 + $0xa4] sm:$0xff] }
 0x113   :  { %1927 = vmatmul.mubr.f32.gmra.mrb[104].mxu1 %v3958_v60 }
 0x114   :  { %1662 = vmatmul.mubr.f32.gmra.mrb[40].mxu0 %v3850_v57  ;;  %1931 = vmatprep.mubr.f32.mxu1 %v4263_v36  ;;  %v2474_v57 = vld [vmem:[%s4807_s0 + $0x24] sm:$0xff] }
 0x115   :  { %1666 = vmatprep.mubr.f32.mxu0 %v2460_v53 }
 0x116   :  { %v4273_v49 = vpop.f32.mrb[0].mxu1 }
 0x117   :  { %1932 = vmatmul.mubr.f32.gmra.mrb[106].mxu1 %v3970_v9  ;;  %v1115_v55 = vpop.f32.mrb[1].mxu1 }
 0x118   :  { %1667 = vmatmul.mubr.f32.gmra.mrb[42].mxu0 %v3862_v61  ;;  %1936 = vmatprep.mubr.f32.mxu1 %v4271_v39  ;;  %v2496_v55 = vld [vmem:[%s4807_s0 + $0xd4] sm:$0xff] }
 0x119   :  { %1671 = vmatprep.mubr.f32.mxu0 %v2461_v56 }
 0x11a   :  { %v4286_v19 = vpop.f32.mrb[2].mxu1 }
 0x11b   :  { %1937 = vmatmul.mubr.f32.gmra.mrb[108].mxu1 %v4281_v63  ;;  %v1120_v22 = vpop.f32.mrb[3].mxu1 }
 0x11c   :  { %1672 = vmatmul.mubr.f32.gmra.mrb[44].mxu0 %v3874_v7  ;;  %1941 = vmatprep.mubr.f32.mxu1 %v2471_v6  ;;  %v2497_v22 = vld [vmem:[%s4807_s0 + $0xdc] sm:$0xff] }
 0x11d   :  { %1676 = vmatprep.mubr.f32.mxu0 %v2462_v1  ;;  %v2491_v1 = vld [vmem:[%s4807_s0 + $0xac] sm:$0xff] }
 0x11e   :  { %v4296_v38 = vpop.f32.mrb[4].mxu1 }
 0x11f   :  { %1942 = vmatmul.mubr.f32.gmra.mrb[110].mxu1 %v2439_v29  ;;  %v1125_v45 = vpop.f32.mrb[5].mxu1  ;;  %v2498_v29 = vld [vmem:[%s4807_s0 + $0xe4] sm:$0xff] }
 0x120   :  { %1677 = vmatmul.mubr.f32.gmra.mrb[46].mxu0 %v3886_v11  ;;  %2585 = vmatprep.mubr.f32.mxu1 %v2472_v33  ;;  %v2475_v11 = vld [vmem:[%s4807_s0 + $0x2c] sm:$0xff] }
 0x121   :  { %1681 = vmatprep.mubr.f32.mxu0 %v2463_v4  ;;  %v2492_v4 = vld [vmem:[%s4807_s0 + $0xb4] sm:$0xff] }
 0x122   :  { %v4305_v61 = vpop.f32.mrb[6].mxu1 }
 0x123   :  { %2586 = vmatmul.mubr.f32.vlgmr.msra.gmra.mrb[112].mxu1 %v2473_v50  ;;  %v1130_v7 = vpop.f32.mrb[7].mxu1  ;;  %v2499_v50 = vld [vmem:[%s4807_s0 + $0xec] sm:$0xff] }
 0x124   :  { %1682 = vmatmul.mubr.f32.gmra.mrb[48].mxu0 %v3898_v18  ;;  %2588 = vmatprep.mubr.f32.mxu1 %v2474_v57  ;;  %v2477_v18 = vld [vmem:[%s4807_s0 + $0x3c] sm:$0xff]  ;;  %v2500_v57 = vld [vmem:[%s4807_s0 + $0xf4] sm:$0xff] }
 0x125   :  { %1686 = vmatprep.mubr.f32.mxu0 %v4216_v12 }
 0x126   :  { %v4315_v30 = vpop.f32.mrb[8].mxu1 }
 0x127   :  { %2589 = vmatmul.mubr.f32.gmra.mrb[114].mxu1 %v2475_v11  ;;  %v1135_v47 = vpop.f32.mrb[9].mxu1 }
 0x128   :  { %1687 = vmatmul.mubr.f32.gmra.mrb[50].mxu0 %v3910_v27  ;;  %2591 = vmatprep.mubr.f32.mxu1 %v2476_v10  ;;  %v2479_v27 = vld [vmem:[%s4807_s0 + $0x4c] sm:$0xff]  ;;  %v2501_v10 = vld [vmem:[%s4807_s0 + $0xfc] sm:$0xff]  ;;  %v2502_v47 = vld [vmem:[%s4807_s0 + $0x104] sm:$0xff] }
 0x129   :  { %1691 = vmatprep.mubr.f32.mxu0 %v4227_v16 }
 0x12a   :  { %v4325_v2 = vpop.f32.mrb[10].mxu1 }
 0x12b   :  { %2592 = vmatmul.mubr.f32.gmra.mrb[116].mxu1 %v2477_v18  ;;  %v1140_v3 = vpop.f32.mrb[11].mxu1 }
 0x12c   :  { %1692 = vmatmul.mubr.f32.gmra.mrb[52].mxu0 %v3922_v34  ;;  %2594 = vmatprep.mubr.f32.mxu1 %v2478_v42  ;;  %v2481_v34 = vld [vmem:[%s4807_s0 + $0x5c] sm:$0xff]  ;;  %v2503_v3 = vld [vmem:[%s4807_s0 + $0x10c] sm:$0xff] }
 0x12d   :  { %1696 = vmatprep.mubr.f32.mxu0 %v4237_v0  ;;  %v2493_v0 = vld [vmem:[%s4807_s0 + $0xbc] sm:$0xff] }
 0x12e   :  { %v4335_v62 = vpop.f32.mrb[12].mxu1 }
 0x12f   :  { %2595 = vmatmul.mubr.f32.gmra.mrb[118].mxu1 %v2479_v27  ;;  %v1145_v15 = vpop.f32.mrb[13].mxu1 }
 0x130   :  { %1697 = vmatmul.mubr.f32.gmra.mrb[54].mxu0 %v3934_v44  ;;  %2597 = vmatprep.mubr.f32.mxu1 %v2480_v13  ;;  %v2483_v44 = vld [vmem:[%s4807_s0 + $0x6c] sm:$0xff] }
 0x131   :  { %1701 = vmatprep.mubr.f32.mxu0 %v4246_v24  ;;  %v2494_v24 = vld [vmem:[%s4807_s0 + $0xc4] sm:$0xff] }
 0x132   :  { %v4345_v31 = vpop.f32.mrb[14].mxu1 }
 0x133   :  { %2598 = vmatmul.mubr.f32.gmra.mrb[120].mxu1 %v2481_v34  ;;  %v1150_v8 = vpop.f32.mrb[15].mxu1 }
 0x134   :  { %1702 = vmatmul.mubr.f32.gmra.mrb[56].mxu0 %v3946_v52  ;;  %2600 = vmatprep.mubr.f32.mxu1 %v2482_v20  ;;  %v2485_v52 = vld [vmem:[%s4807_s0 + $0x7c] sm:$0xff] }
 0x135   :  { %1706 = vmatprep.mubr.f32.mxu0 %v4255_v28 }
 0x136   :  { %v4355_v40 = vpop.f32.mrb[16].mxu1 }
 0x137   :  { %2601 = vmatmul.mubr.f32.gmra.mrb[122].mxu1 %v2483_v44  ;;  %v1155_v41 = vpop.f32.mrb[17].mxu1 }
 0x138   :  { %1707 = vmatmul.mubr.f32.gmra.mrb[58].mxu0 %v3958_v60  ;;  %2603 = vmatprep.mubr.f32.mxu1 %v2484_v37  ;;  %v2487_v60 = vld [vmem:[%s4807_s0 + $0x8c] sm:$0xff] }
 0x139   :  { %1711 = vmatprep.mubr.f32.mxu0 %v4263_v36 }
 0x13a   :  { %v4365_v25 = vpop.f32.mrb[18].mxu1 }
 0x13b   :  { %2604 = vmatmul.mubr.f32.gmra.mrb[124].mxu1 %v2485_v52  ;;  %v1160_v48 = vpop.f32.mrb[19].mxu1 }
 0x13c   :  { %1712 = vmatmul.mubr.f32.gmra.mrb[60].mxu0 %v3970_v9  ;;  %2606 = vmatprep.mubr.f32.mxu1 %v2486_v17  ;;  %v2489_v9 = vld [vmem:[%s4807_s0 + $0x9c] sm:$0xff] }
 0x13d   :  { %1716 = vmatprep.mubr.f32.mxu0 %v4271_v39  ;;  %v2495_v39 = vld [vmem:[%s4807_s0 + $0xcc] sm:$0xff] }
 0x13e   :  { %v4375_v26 = vpop.f32.mrb[20].mxu1 }
 0x13f   :  { %2607 = vmatmul.mubr.f32.gmra.mrb[126].mxu1 %v2487_v60  ;;  %v1165_v35 = vpop.f32.mrb[21].mxu1 }
 0x140   :  { %1717 = vmatmul.mubr.f32.gmra.mrb[62].mxu0 %v4281_v63  ;;  %2609 = vmatprep.mubr.f32.mxu1 %v2488_v58 }
 0x141   :  { %1786 = vmatprep.mubr.f32.mxu0 %v3991_v21  ;;  %v2409_v21 = vld [vmem:[%s4807_s0 + $0x1a] sm:$0xff] }
 0x142   :  { %v4388_v53 = vpop.f32.mrb[22].mxu1 }
 0x143   :  { %2610 = vmatmul.mubr.f32.gmra.mrb[128].mxu1 %v2489_v9  ;;  %v1170_v56 = vpop.f32.mrb[23].mxu1 }
 0x144   :  { %1787 = vmatmul.mubr.f32.vlgmr.msra.gmra.mrb[0].mxu0 %v2408_v43  ;;  %2612 = vmatprep.mubr.f32.mxu1 %v2490_v46 }
 0x145   :  { %1791 = vmatprep.mubr.f32.mxu0 %v4018_v51  ;;  %v2410_v51 = vld [vmem:[%s4807_s0 + $0x22] sm:$0xff] }
 0x146   :  { %v4400_v12 = vpop.f32.mrb[24].mxu1 }
 0x147   :  { %2613 = vmatmul.mubr.f32.gmra.mrb[130].mxu1 %v2491_v1  ;;  %v1175_v16 = vpop.f32.mrb[25].mxu1 }
 0x148   :  { %1792 = vmatmul.mubr.f32.gmra.mrb[2].mxu0 %v2409_v21  ;;  %2615 = vmatprep.mubr.f32.mxu1 %v2492_v4 }
 0x149   :  { %1796 = vmatprep.mubr.f32.mxu0 %v4040_v59  ;;  %v2411_v59 = vld [vmem:[%s4807_s0 + $0x2a] sm:$0xff] }
 0x14a   :  { %v4412_v28 = vpop.f32.mrb[26].mxu1 }
 0x14b   :  { %2616 = vmatmul.mubr.f32.gmra.mrb[132].mxu1 %v2493_v0  ;;  %v1180_v36 = vpop.f32.mrb[27].mxu1 }
 0x14c   :  { %1797 = vmatmul.mubr.f32.gmra.mrb[4].mxu0 %v2410_v51  ;;  %2618 = vmatprep.mubr.f32.mxu1 %v2494_v24 }
 0x14d   :  { %1801 = vmatprep.mubr.f32.mxu0 %v4062_v5  ;;  %v2412_v5 = vld [vmem:[%s4807_s0 + $0x32] sm:$0xff] }
 0x14e   :  { %v4424_v63 = vpop.f32.mrb[28].mxu1 }
 0x14f   :  { %2619 = vmatmul.mubr.f32.gmra.mrb[134].mxu1 %v2495_v39  ;;  %v1185_v6 = vpop.f32.mrb[29].mxu1 }
 0x150   :  { %1802 = vmatmul.mubr.f32.gmra.mrb[6].mxu0 %v2411_v59  ;;  %2621 = vmatprep.mubr.f32.mxu1 %v2496_v55 }
 0x151   :  { %1806 = vmatprep.mubr.f32.mxu0 %v4084_v14  ;;  %v2413_v14 = vld [vmem:[%s4807_s0 + $0x3a] sm:$0xff] }
 0x152   :  { %v4436_v33 = vpop.f32.mrb[30].mxu1 }
 0x153   :  { %2622 = vmatmul.mubr.f32.gmra.mrb[136].mxu1 %v2497_v22  ;;  %v1190_v45 = vpop.f32.mrb[31].mxu1 }
 0x154   :  { %1807 = vmatmul.mubr.f32.gmra.mrb[8].mxu0 %v2412_v5  ;;  %2624 = vmatprep.mubr.f32.mxu1 %v2498_v29 }
 0x155   :  { %1811 = vmatprep.mubr.f32.mxu0 %v4106_v23  ;;  %v2414_v23 = vld [vmem:[%s4807_s0 + $0x42] sm:$0xff] }
 0x156   :  { %v4448_v7 = vpop.f32.mrb[32].mxu1 }
 0x157   :  { %2625 = vmatmul.mubr.f32.gmra.mrb[138].mxu1 %v2499_v50  ;;  %v1195_v11 = vpop.f32.mrb[33].mxu1 }
 0x158   :  { %1812 = vmatmul.mubr.f32.gmra.mrb[10].mxu0 %v2413_v14  ;;  %2627 = vmatprep.mubr.f32.mxu1 %v2500_v57 }
 0x159   :  { %1816 = vmatprep.mubr.f32.mxu0 %v4128_v32  ;;  %v2415_v32 = vld [vmem:[%s4807_s0 + $0x4a] sm:$0xff] }
 0x15a   :  { %v4460_v18 = vpop.f32.mrb[34].mxu1 }
 0x15b   :  { %2628 = vmatmul.mubr.f32.gmra.mrb[140].mxu1 %v2501_v10  ;;  %v1200_v42 = vpop.f32.mrb[35].mxu1 }
 0x15c   :  { %1817 = vmatmul.mubr.f32.gmra.mrb[12].mxu0 %v2414_v23  ;;  %2630 = vmatprep.mubr.f32.mxu1 %v2502_v47 }
 0x15d   :  { %1821 = vmatprep.mubr.f32.mxu0 %v4144_v54 }
 0x15e   :  { %v4469_v27 = vpop.f32.mrb[36].mxu1 }
 0x15f   :  { %2631 = vmatmul.mubr.f32.gmra.mrb[142].mxu1 %v2503_v3  ;;  %v1205_v13 = vpop.f32.mrb[37].mxu1  ;;  %v4500_v3 = vld [vmem:[%s4808_s2] ss:$0 sm:$0xff] }
 0x160   :  { %1822 = vmatmul.mubr.f32.gmra.mrb[14].mxu0 %v2415_v32  ;;  %v1154_v32 = vadd.f32 %v4500_v3, %v4355_v40  ;;  %v1164_v40 = vadd.f32 %v4500_v3, %v4375_v26  ;;  %v1174_v26 = vadd.f32 %v4500_v3, %v4400_v12  ;;  %v1184_v12 = vadd.f32 %v4500_v3, %v4424_v63 }
 0x161   :  { %v1194_v63 = vadd.f32 %v4500_v3, %v4448_v7 }
 0x162   :  { %v4471_v15 = vpop.f32.mrb[38].mxu1 }
 0x163   :  { %v1210_v34 = vpop.f32.mrb[39].mxu1 }
 0x166   :  { %v4473_v20 = vpop.f32.mrb[40].mxu1 }
 0x167   :  { %v1215_v8 = vpop.f32.mrb[41].mxu1 }
 0x16a   :  { %v4475_v44 = vpop.f32.mrb[42].mxu1 }
 0x16b   :  { %v1220_v37 = vpop.f32.mrb[43].mxu1 }
 0x16e   :  { %v4477_v41 = vpop.f32.mrb[44].mxu1 }
 0x16f   :  { %v1225_v54 = vpop.f32.mrb[45].mxu1 }
 0x172   :  { %v4479_v52 = vpop.f32.mrb[46].mxu1 }
 0x173   :  { %v1230_v17 = vpop.f32.mrb[47].mxu1 }
 0x174   :  { %v1159_v17 = vadd.f32 %v4500_v3, %v4365_v25  ;;  %v1169_v25 = vadd.f32 %v4500_v3, %v4388_v53  ;;  %v1179_v53 = vadd.f32 %v4500_v3, %v4412_v28  ;;  %v1189_v28 = vadd.f32 %v4500_v3, %v4436_v33 }
 0x175   :  { %v1199_v33 = vadd.f32 %v4500_v3, %v4460_v18 }
 0x176   :  { %v4481_v48 = vpop.f32.mrb[48].mxu1 }
 0x177   :  { %v1235_v60 = vpop.f32.mrb[49].mxu1 }
 0x17a   :  { %v4483_v58 = vpop.f32.mrb[50].mxu1 }
 0x17b   :  { %v1240_v35 = vpop.f32.mrb[51].mxu1 }
 0x17e   :  { %v4485_v9 = vpop.f32.mrb[52].mxu1 }
 0x17f   :  { %v1245_v43 = vpop.f32.mrb[53].mxu1 }
 0x182   :  { %v4487_v46 = vpop.f32.mrb[54].mxu1 }
 0x183   :  { %v1250_v56 = vpop.f32.mrb[55].mxu1 }
 0x186   :  { %v4489_v1 = vpop.f32.mrb[56].mxu1 }
 0x187   :  { %v1255_v21 = vpop.f32.mrb[57].mxu1 }
 0x18a   :  { %v4491_v4 = vpop.f32.mrb[58].mxu1 }
 0x18b   :  { %v1260_v16 = vpop.f32.mrb[59].mxu1 }
 0x18e   :  { %v4493_v0 = vpop.f32.mrb[60].mxu1 }
 0x18f   :  { %v1265_v51 = vpop.f32.mrb[61].mxu1 }
 0x192   :  { %v4495_v24 = vpop.f32.mrb[62].mxu1 }
 0x193   :  { %v1270_v36 = vpop.f32.mrb[63].mxu1 }
 0x196   :  { %v1828_v39 = vpop.f32.mrb[64].mxu1 }
 0x197   :  { %v1830_v59 = vpop.f32.mrb[65].mxu1 }
 0x19a   :  { %v1833_v55 = vpop.f32.mrb[66].mxu1 }
 0x19b   :  { %v1835_v6 = vpop.f32.mrb[67].mxu1 }
 0x19e   :  { %v1838_v22 = vpop.f32.mrb[68].mxu1 }
 0x19f   :  { %v1840_v5 = vpop.f32.mrb[69].mxu1 }
 0x1a2   :  { %v1843_v29 = vpop.f32.mrb[70].mxu1 }
 0x1a3   :  { %v1845_v45 = vpop.f32.mrb[71].mxu1 }
 0x1a6   :  { %v1848_v50 = vpop.f32.mrb[72].mxu1 }
 0x1a7   :  { %v1850_v14 = vpop.f32.mrb[73].mxu1 }
 0x1aa   :  { %v1853_v57 = vpop.f32.mrb[74].mxu1 }
 0x1ab   :  { %v1855_v11 = vpop.f32.mrb[75].mxu1 }
 0x1ae   :  { %v1858_v10 = vpop.f32.mrb[76].mxu1 }
 0x1af   :  { %v1860_v23 = vpop.f32.mrb[77].mxu1 }
 0x1b2   :  { %v1863_v47 = vpop.f32.mrb[78].mxu1 }
 0x1b3   :  { %v1865_v42 = vpop.f32.mrb[79].mxu1 }
 0x1b6   :  { %v4504_v13 = vpop.f32.mrb[80].mxu1 }
 0x1b7   :  { %v1603_v34 = vpop.f32.mrb[16].mxu0  ;;  %v1870_v8 = vpop.f32.mrb[81].mxu1 }
 0x1b8   :  { %v2906_v37 = vadd.f32 %v1603_v34, %v1154_v32  ;;  %v1605_v54 = vpop.f32.mrb[17].mxu0 }
 0x1ba   :  { %v4508_v60 = vpop.f32.mrb[82].mxu1  ;;  %v4510_v35 = vadd.f32 %v2906_v37, %v1828_v39 }
 0x1bb   :  { %v1608_v43 = vpop.f32.mrb[18].mxu0  ;;  %v1875_v56 = vpop.f32.mrb[83].mxu1 }
 0x1bc   :  { %v2909_v21 = vadd.f32 %v1608_v43, %v1159_v17  ;;  %v1610_v16 = vpop.f32.mrb[19].mxu0 }
 0x1be   :  { %v4514_v51 = vpop.f32.mrb[84].mxu1  ;;  %v4516_v36 = vadd.f32 %v2909_v21, %v1833_v55 }
 0x1bf   :  { %v1613_v59 = vpop.f32.mrb[20].mxu0  ;;  %v1880_v6 = vpop.f32.mrb[85].mxu1 }
 0x1c0   :  { %v2912_v5 = vadd.f32 %v1613_v59, %v1164_v40  ;;  %v1615_v45 = vpop.f32.mrb[21].mxu0 }
 0x1c2   :  { %v4520_v39 = vpop.f32.mrb[86].mxu1  ;;  %v4522_v14 = vadd.f32 %v2912_v5, %v1838_v22 }
 0x1c3   :  { %v1618_v11 = vpop.f32.mrb[22].mxu0  ;;  %v1885_v23 = vpop.f32.mrb[87].mxu1 }
 0x1c4   :  { %v2915_v42 = vadd.f32 %v1618_v11, %v1169_v25  ;;  %v1620_v32 = vpop.f32.mrb[23].mxu0 }
 0x1c6   :  { %v4526_v55 = vpop.f32.mrb[88].mxu1  ;;  %v4528_v34 = vadd.f32 %v2915_v42, %v1843_v29 }
 0x1c7   :  { %v1623_v8 = vpop.f32.mrb[24].mxu0  ;;  %v1890_v37 = vpop.f32.mrb[89].mxu1 }
 0x1c8   :  { %v2918_v54 = vadd.f32 %v1623_v8, %v1174_v26  ;;  %v1625_v17 = vpop.f32.mrb[25].mxu0 }
 0x1ca   :  { %v4532_v22 = vpop.f32.mrb[90].mxu1  ;;  %v4534_v43 = vadd.f32 %v2918_v54, %v1848_v50 }
 0x1cb   :  { %v1628_v56 = vpop.f32.mrb[26].mxu0  ;;  %v1895_v21 = vpop.f32.mrb[91].mxu1 }
 0x1cc   :  { %v2921_v16 = vadd.f32 %v1628_v56, %v1179_v53  ;;  %v1630_v40 = vpop.f32.mrb[27].mxu0 }
 0x1ce   :  { %v4538_v29 = vpop.f32.mrb[92].mxu1  ;;  %v4540_v59 = vadd.f32 %v2921_v16, %v1853_v57 }
 0x1cf   :  { %v1633_v6 = vpop.f32.mrb[28].mxu0  ;;  %v1900_v5 = vpop.f32.mrb[93].mxu1 }
 0x1d0   :  { %v2924_v45 = vadd.f32 %v1633_v6, %v1184_v12  ;;  %v1635_v25 = vpop.f32.mrb[29].mxu0 }
 0x1d2   :  { %v4544_v50 = vpop.f32.mrb[94].mxu1  ;;  %v4546_v11 = vadd.f32 %v2924_v45, %v1858_v10 }
 0x1d3   :  { %v1638_v23 = vpop.f32.mrb[30].mxu0  ;;  %v1905_v42 = vpop.f32.mrb[95].mxu1 }
 0x1d4   :  { %v2927_v32 = vadd.f32 %v1638_v23, %v1189_v28  ;;  %v1640_v26 = vpop.f32.mrb[31].mxu0 }
 0x1d6   :  { %v4550_v57 = vpop.f32.mrb[96].mxu1  ;;  %v4552_v8 = vadd.f32 %v2927_v32, %v1863_v47  ;;  %v1204_v47 = vadd.f32 %v4500_v3, %v4469_v27 }
 0x1d7   :  { %v1643_v37 = vpop.f32.mrb[32].mxu0  ;;  %v1910_v54 = vpop.f32.mrb[97].mxu1 }
 0x1d8   :  { %v2930_v17 = vadd.f32 %v1643_v37, %v1194_v63  ;;  %v1645_v53 = vpop.f32.mrb[33].mxu0 }
 0x1da   :  { %v4556_v10 = vpop.f32.mrb[98].mxu1  ;;  %v4559_v56 = vadd.f32 %v2930_v17, %v4504_v13  ;;  %v1209_v13 = vadd.f32 %v4500_v3, %v4471_v15 }
 0x1db   :  { %v1648_v21 = vpop.f32.mrb[34].mxu0  ;;  %v1915_v16 = vpop.f32.mrb[99].mxu1 }
 0x1dc   :  { %v2933_v40 = vadd.f32 %v1648_v21, %v1199_v33  ;;  %v1650_v7 = vpop.f32.mrb[35].mxu0 }
 0x1de   :  { %v4563_v12 = vpop.f32.mrb[100].mxu1  ;;  %v4566_v6 = vadd.f32 %v2933_v40, %v4508_v60  ;;  %v1214_v60 = vadd.f32 %v4500_v3, %v4473_v20 }
 0x1df   :  { %v1653_v5 = vpop.f32.mrb[36].mxu0  ;;  %v1920_v45 = vpop.f32.mrb[101].mxu1 }
 0x1e0   :  { %v2936_v18 = vadd.f32 %v1653_v5, %v1204_v47  ;;  %v1655_v25 = vpop.f32.mrb[37].mxu0 }
 0x1e2   :  { %v4570_v28 = vpop.f32.mrb[102].mxu1  ;;  %v4573_v23 = vadd.f32 %v2936_v18, %v4514_v51  ;;  %v1219_v51 = vadd.f32 %v4500_v3, %v4475_v44 }
 0x1e3   :  { %v1658_v42 = vpop.f32.mrb[38].mxu0  ;;  %v1925_v32 = vpop.f32.mrb[103].mxu1 }
 0x1e4   :  { %v2939_v27 = vadd.f32 %v1658_v42, %v1209_v13  ;;  %v1660_v26 = vpop.f32.mrb[39].mxu0 }
 0x1e6   :  { %v4577_v63 = vpop.f32.mrb[104].mxu1  ;;  %v4580_v37 = vadd.f32 %v2939_v27, %v4520_v39  ;;  %v1224_v39 = vadd.f32 %v4500_v3, %v4477_v41 }
 0x1e7   :  { %v1663_v54 = vpop.f32.mrb[40].mxu0  ;;  %v1930_v17 = vpop.f32.mrb[105].mxu1 }
 0x1e8   :  { %v2942_v15 = vadd.f32 %v1663_v54, %v1214_v60  ;;  %v1665_v53 = vpop.f32.mrb[41].mxu0 }
 0x1ea   :  { %v4584_v33 = vpop.f32.mrb[106].mxu1  ;;  %v4587_v21 = vadd.f32 %v2942_v15, %v4526_v55  ;;  %v1229_v55 = vadd.f32 %v4500_v3, %v4479_v52 }
 0x1eb   :  { %v1668_v16 = vpop.f32.mrb[42].mxu0  ;;  %v1935_v40 = vpop.f32.mrb[107].mxu1 }
 0x1ec   :  { %v2945_v20 = vadd.f32 %v1668_v16, %v1219_v51  ;;  %v1670_v7 = vpop.f32.mrb[43].mxu0 }
 0x1ee   :  { %v4591_v47 = vpop.f32.mrb[108].mxu1  ;;  %v4594_v5 = vadd.f32 %v2945_v20, %v4532_v22  ;;  %v1234_v22 = vadd.f32 %v4500_v3, %v4481_v48 }
 0x1ef   :  { %v1673_v45 = vpop.f32.mrb[44].mxu0  ;;  %v1940_v18 = vpop.f32.mrb[109].mxu1 }
 0x1f0   :  { %v2948_v44 = vadd.f32 %v1673_v45, %v1224_v39  ;;  %v1675_v25 = vpop.f32.mrb[45].mxu0 }
 0x1f2   :  { %v4598_v13 = vpop.f32.mrb[110].mxu1  ;;  %v4601_v42 = vadd.f32 %v2948_v44, %v4538_v29  ;;  %v1239_v29 = vadd.f32 %v4500_v3, %v4483_v58 }
 0x1f3   :  { %v1678_v32 = vpop.f32.mrb[46].mxu0  ;;  %v1945_v27 = vpop.f32.mrb[111].mxu1 }
 0x1f4   :  { %v2951_v41 = vadd.f32 %v1678_v32, %v1229_v55  ;;  %v1680_v26 = vpop.f32.mrb[47].mxu0 }
 0x1f6   :  { %v4605_v60 = vpop.f32.mrb[112].mxu1  ;;  %v4608_v54 = vadd.f32 %v2951_v41, %v4544_v50  ;;  %v1244_v50 = vadd.f32 %v4500_v3, %v4485_v9 }
 0x1f7   :  { %v1683_v17 = vpop.f32.mrb[48].mxu0  ;;  %v4610_v15 = vpop.f32.mrb[113].mxu1 }
 0x1f8   :  { %v2954_v52 = vadd.f32 %v1683_v17, %v1234_v22  ;;  %v1685_v53 = vpop.f32.mrb[49].mxu0 }
 0x1fa   :  { %v4614_v51 = vpop.f32.mrb[114].mxu1  ;;  %v4617_v16 = vadd.f32 %v2954_v52, %v4550_v57  ;;  %v1249_v57 = vadd.f32 %v4500_v3, %v4487_v46 }
 0x1fb   :  { %v1688_v40 = vpop.f32.mrb[50].mxu0  ;;  %v4619_v48 = vpop.f32.mrb[115].mxu1 }
 0x1fc   :  { %v2957_v20 = vadd.f32 %v1688_v40, %v1239_v29  ;;  %v1690_v7 = vpop.f32.mrb[51].mxu0 }
 0x1fd   :  { %v1259_v7 = vadd.f32 %v4500_v3, %v4491_v4 }
 0x1fe   :  { %v4623_v39 = vpop.f32.mrb[116].mxu1  ;;  %v4626_v45 = vadd.f32 %v2957_v20, %v4556_v10  ;;  %v1254_v10 = vadd.f32 %v4500_v3, %v4489_v1 }
 0x1ff   :  { %v1693_v18 = vpop.f32.mrb[52].mxu0  ;;  %v4628_v58 = vpop.f32.mrb[117].mxu1 }
 0x200   :  { %v2960_v44 = vadd.f32 %v1693_v18, %v1244_v50  ;;  %v1695_v25 = vpop.f32.mrb[53].mxu0 }
 0x202   :  { %v4632_v55 = vpop.f32.mrb[118].mxu1  ;;  %v4635_v32 = vadd.f32 %v2960_v44, %v4563_v12 }
 0x203   :  { %v1698_v27 = vpop.f32.mrb[54].mxu0  ;;  %v4637_v9 = vpop.f32.mrb[119].mxu1 }
 0x204   :  { %v2963_v41 = vadd.f32 %v1698_v27, %v1249_v57  ;;  %v1700_v26 = vpop.f32.mrb[55].mxu0 }
 0x206   :  { %v2599_v22 = vpop.f32.mrb[120].mxu1  ;;  %v4642_v17 = vadd.f32 %v2963_v41, %v4570_v28 }
 0x207   :  { %v1703_v52 = vpop.f32.mrb[56].mxu0  ;;  %v2059_v46 = vadd.f32 %v4516_v36, %v2599_v22  ;;  %v2053_v53 = vpop.f32.mrb[121].mxu1 }
 0x208   :  { %v2966_v29 = vadd.f32 %v1703_v52, %v1254_v10  ;;  %v1705_v40 = vpop.f32.mrb[57].mxu0  ;;  %v2054_v12 = vadd.f32 %v4510_v35, %v2053_v53 }
 0x209   :  { %v2181_v20 = vmax.f32 %v2059_v46, 0.0 }
 0x20a   :  { %v2180_v50 = vmax.f32 %v2054_v12, 0.0  ;;  %v2602_v18 = vpop.f32.mrb[122].mxu1  ;;  %v4649_v1 = vadd.f32 %v2966_v29, %v4577_v63  ;;  %v1264_v63 = vadd.f32 %v4500_v3, %v4493_v0 }
 0x20b   :  { %2213 = vst [vmem:[%s4809_s3 + $0x48] sm:$0xff] %v2181_v20  ;;  %v1708_v28 = vpop.f32.mrb[58].mxu0  ;;  %v2069_v36 = vadd.f32 %v4528_v34, %v2602_v18  ;;  %v2063_v44 = vpop.f32.mrb[123].mxu1 }
 0x20c   :  { %2212 = vst [vmem:[%s4809_s3 + $0x40] sm:$0xff] %v2180_v50  ;;  %v2969_v35 = vadd.f32 %v1708_v28, %v1259_v7  ;;  %v1710_v25 = vpop.f32.mrb[59].mxu0  ;;  %v2064_v4 = vadd.f32 %v4522_v14, %v2063_v44 }
 0x20d   :  { %v2183_v57 = vmax.f32 %v2069_v36, 0.0 }
 0x20e   :  { %v2182_v27 = vmax.f32 %v2064_v4, 0.0  ;;  %v2605_v41 = vpop.f32.mrb[124].mxu1  ;;  %v4662_v26 = vadd.f32 %v2969_v35, %v4584_v33  ;;  %v1269_v33 = vadd.f32 %v4500_v3, %v4495_v24 }
 0x20f   :  { %2215 = vst [vmem:[%s4809_s3 + $0x58] sm:$0xff] %v2183_v57  ;;  %v1713_v34 = vpop.f32.mrb[60].mxu0  ;;  %v2079_v10 = vadd.f32 %v4540_v59, %v2605_v41  ;;  %v2073_v22 = vpop.f32.mrb[125].mxu1 }
 0x210   :  { %2214 = vst [vmem:[%s4809_s3 + $0x50] sm:$0xff] %v2182_v27  ;;  %v2972_v14 = vadd.f32 %v1713_v34, %v1264_v63  ;;  %v1715_v52 = vpop.f32.mrb[61].mxu0  ;;  %v2074_v0 = vadd.f32 %v4534_v43, %v2073_v22 }
 0x211   :  { %v2185_v46 = vmax.f32 %v2079_v10, 0.0 }
 0x212   :  { %v2184_v53 = vmax.f32 %v2074_v0, 0.0  ;;  %v2608_v29 = vpop.f32.mrb[126].mxu1  ;;  %v4675_v40 = vadd.f32 %v2972_v14, %v4591_v47  ;;  %v1114_v47 = vadd.f32 %v4500_v3, %v4273_v49  ;;  %v1124_v14 = vadd.f32 %v4500_v3, %v4296_v38 }
 0x213   :  { %2217 = vst [vmem:[%s4809_s3 + $0x68] sm:$0xff] %v2185_v46  ;;  %v1718_v59 = vpop.f32.mrb[62].mxu0  ;;  %v2089_v12 = vadd.f32 %v4552_v8, %v2608_v29  ;;  %v2083_v20 = vpop.f32.mrb[127].mxu1 }
 0x214   :  { %2216 = vst [vmem:[%s4809_s3 + $0x60] sm:$0xff] %v2184_v53  ;;  %v2975_v43 = vadd.f32 %v1718_v59, %v1269_v33  ;;  %v1720_v7 = vpop.f32.mrb[63].mxu0  ;;  %v2084_v24 = vadd.f32 %v4546_v11, %v2083_v20 }
 0x215   :  { %v2187_v50 = vmax.f32 %v2089_v12, 0.0  ;;  %v1129_v12 = vadd.f32 %v4500_v3, %v4305_v61 }
 0x216   :  { %v2186_v18 = vmax.f32 %v2084_v24, 0.0  ;;  %v2611_v28 = vpop.f32.mrb[128].mxu1  ;;  %v4688_v36 = vadd.f32 %v2975_v43, %v4598_v13  ;;  %v1119_v13 = vadd.f32 %v4500_v3, %v4286_v19 }
 0x217   :  { %2219 = vst [vmem:[%s4809_s3 + $0x78] sm:$0xff] %v2187_v50  ;;  %v1788_v8 = vpop.f32.mrb[0].mxu0  ;;  %v2099_v44 = vadd.f32 %v4566_v6, %v2611_v28  ;;  %v2093_v35 = vpop.f32.mrb[129].mxu1  ;;  %v1134_v28 = vadd.f32 %v4500_v3, %v4315_v30 }
 0x218   :  { %2218 = vst [vmem:[%s4809_s3 + $0x70] sm:$0xff] %v2186_v18  ;;  %v2890_v11 = vadd.f32 %v1788_v8, %v1114_v47  ;;  %v1790_v25 = vpop.f32.mrb[1].mxu0  ;;  %v2094_v49 = vadd.f32 %v4559_v56, %v2093_v35 }
 0x219   :  { %v2189_v4 = vmax.f32 %v2099_v44, 0.0 }
 0x21a   :  { %v2014_v57 = vadd.f32 %v2890_v11, %v4610_v15  ;;  %v2188_v63 = vmax.f32 %v2094_v49, 0.0  ;;  %v2614_v27 = vpop.f32.mrb[130].mxu1 }
 0x21b   :  { %2221 = vst [vmem:[%s4809_s3 + $0x88] sm:$0xff] %v2189_v4  ;;  %v1793_v6 = vpop.f32.mrb[2].mxu0  ;;  %v2109_v41 = vadd.f32 %v4580_v37, %v2614_v27  ;;  %v2103_v34 = vpop.f32.mrb[131].mxu1 }
 0x21c   :  { %v2172_v10 = vmax.f32 %v2014_v57, 0.0  ;;  %2220 = vst [vmem:[%s4809_s3 + $0x80] sm:$0xff] %v2188_v63  ;;  %v2892_v56 = vadd.f32 %v1793_v6, %v1119_v13  ;;  %v1795_v22 = vpop.f32.mrb[3].mxu0  ;;  %v2104_v19 = vadd.f32 %v4573_v23, %v2103_v34  ;;  %v1139_v13 = vadd.f32 %v4500_v3, %v4325_v2 }
 0x21d   :  { %v2191_v15 = vmax.f32 %v2109_v41, 0.0 }
 0x21e   :  { %2204 = vst [vmem:[%s4809_s3] sm:$0xff] %v2172_v10  ;;  %v2019_v37 = vadd.f32 %v2892_v56, %v4605_v60  ;;  %v2190_v52 = vmax.f32 %v2104_v19, 0.0  ;;  %v2617_v0 = vpop.f32.mrb[132].mxu1  ;;  %v1144_v56 = vadd.f32 %v4500_v3, %v4335_v62 }
 0x21f   :  { %2223 = vst [vmem:[%s4809_s3 + $0x98] sm:$0xff] %v2191_v15  ;;  %v1798_v46 = vpop.f32.mrb[4].mxu0  ;;  %v2119_v33 = vadd.f32 %v4594_v5, %v2617_v0  ;;  %v2113_v23 = vpop.f32.mrb[133].mxu1 }
 0x220   :  { %v2173_v53 = vmax.f32 %v2019_v37, 0.0  ;;  %2222 = vst [vmem:[%s4809_s3 + $0x90] sm:$0xff] %v2190_v52  ;;  %v2894_v38 = vadd.f32 %v1798_v46, %v1124_v14  ;;  %v1800_v29 = vpop.f32.mrb[5].mxu0  ;;  %v2114_v59 = vadd.f32 %v4587_v21, %v2113_v23  ;;  %v1149_v46 = vadd.f32 %v4500_v3, %v4345_v31 }
 0x221   :  { %v2193_v60 = vmax.f32 %v2119_v33, 0.0 }
 0x222   :  { %2205 = vst [vmem:[%s4809_s3 + $0x8] sm:$0xff] %v2173_v53  ;;  %v2024_v5 = vadd.f32 %v2894_v38, %v4619_v48  ;;  %v2192_v20 = vmax.f32 %v2114_v59, 0.0  ;;  %v2620_v43 = vpop.f32.mrb[134].mxu1 }
 0x223   :  { %2225 = vst [vmem:[%s4809_s3 + $0xa8] sm:$0xff] %v2193_v60  ;;  %v1803_v7 = vpop.f32.mrb[6].mxu0  ;;  %v2129_v24 = vadd.f32 %v4608_v54, %v2620_v43  ;;  %v2123_v21 = vpop.f32.mrb[135].mxu1 }
 0x224   :  { %v2174_v50 = vmax.f32 %v2024_v5, 0.0  ;;  %2224 = vst [vmem:[%s4809_s3 + $0xa0] sm:$0xff] %v2192_v20  ;;  %v2896_v61 = vadd.f32 %v1803_v7, %v1129_v12  ;;  %v1805_v47 = vpop.f32.mrb[7].mxu0  ;;  %v2124_v18 = vadd.f32 %v4601_v42, %v2123_v21 }
 0x225   :  { %v2195_v48 = vmax.f32 %v2129_v24, 0.0 }
 0x226   :  { %2206 = vst [vmem:[%s4809_s3 + $0x10] sm:$0xff] %v2174_v50  ;;  %v2029_v54 = vadd.f32 %v2896_v61, %v4614_v51  ;;  %v2194_v8 = vmax.f32 %v2124_v18, 0.0  ;;  %v2623_v44 = vpop.f32.mrb[136].mxu1 }
 0x227   :  { %2227 = vst [vmem:[%s4809_s3 + $0xb8] sm:$0xff] %v2195_v48  ;;  %v1808_v35 = vpop.f32.mrb[8].mxu0  ;;  %v2139_v11 = vadd.f32 %v4626_v45, %v2623_v44  ;;  %v2133_v42 = vpop.f32.mrb[137].mxu1 }
 0x228   :  { %v2175_v25 = vmax.f32 %v2029_v54, 0.0  ;;  %2226 = vst [vmem:[%s4809_s3 + $0xb0] sm:$0xff] %v2194_v8  ;;  %v2898_v30 = vadd.f32 %v1808_v35, %v1134_v28  ;;  %v1810_v49 = vpop.f32.mrb[9].mxu0  ;;  %v2134_v4 = vadd.f32 %v4617_v16, %v2133_v42 }
 0x229   :  { %v2197_v51 = vmax.f32 %v2139_v11, 0.0 }
 0x22a   :  { %2207 = vst [vmem:[%s4809_s3 + $0x18] sm:$0xff] %v2175_v25  ;;  %v2034_v45 = vadd.f32 %v2898_v30, %v4628_v58  ;;  %v2196_v57 = vmax.f32 %v2134_v4, 0.0  ;;  %v2626_v63 = vpop.f32.mrb[138].mxu1 }
 0x22b   :  { %2229 = vst [vmem:[%s4809_s3 + $0xc8] sm:$0xff] %v2197_v51  ;;  %v1813_v27 = vpop.f32.mrb[10].mxu0  ;;  %v2149_v6 = vadd.f32 %v4642_v17, %v2626_v63  ;;  %v2143_v16 = vpop.f32.mrb[139].mxu1 }
 0x22c   :  { %v2176_v41 = vmax.f32 %v2034_v45, 0.0  ;;  %2228 = vst [vmem:[%s4809_s3 + $0xc0] sm:$0xff] %v2196_v57  ;;  %v2900_v2 = vadd.f32 %v1813_v27, %v1139_v13  ;;  %v1815_v34 = vpop.f32.mrb[11].mxu0  ;;  %v2144_v10 = vadd.f32 %v4635_v32, %v2143_v16 }
 0x22d   :  { %v2199_v58 = vmax.f32 %v2149_v6, 0.0 }
 0x22e   :  { %2208 = vst [vmem:[%s4809_s3 + $0x20] sm:$0xff] %v2176_v41  ;;  %v2039_v17 = vadd.f32 %v2900_v2, %v4623_v39  ;;  %v2198_v22 = vmax.f32 %v2144_v10, 0.0  ;;  %v2629_v19 = vpop.f32.mrb[140].mxu1 }
 0x22f   :  { %2231 = vst [vmem:[%s4809_s3 + $0xd8] sm:$0xff] %v2199_v58  ;;  %v1818_v15 = vpop.f32.mrb[12].mxu0  ;;  %v2159_v14 = vadd.f32 %v4662_v26, %v2629_v19  ;;  %v2153_v32 = vpop.f32.mrb[141].mxu1 }
 0x230   :  { %v2177_v37 = vmax.f32 %v2039_v17, 0.0  ;;  %2230 = vst [vmem:[%s4809_s3 + $0xd0] sm:$0xff] %v2198_v22  ;;  %v2902_v62 = vadd.f32 %v1818_v15, %v1144_v56  ;;  %v1820_v52 = vpop.f32.mrb[13].mxu0  ;;  %v2154_v0 = vadd.f32 %v4649_v1, %v2153_v32 }
 0x231   :  { %v2201_v39 = vmax.f32 %v2159_v14, 0.0 }
 0x232   :  { %2209 = vst [vmem:[%s4809_s3 + $0x28] sm:$0xff] %v2177_v37  ;;  %v2044_v26 = vadd.f32 %v2902_v62, %v4637_v9  ;;  %v2200_v33 = vmax.f32 %v2154_v0, 0.0  ;;  %v2632_v23 = vpop.f32.mrb[142].mxu1 }
 0x233   :  { %2233 = vst [vmem:[%s4809_s3 + $0xe8] sm:$0xff] %v2201_v39  ;;  %v1823_v53 = vpop.f32.mrb[14].mxu0  ;;  %v2169_v38 = vadd.f32 %v4688_v36, %v2632_v23  ;;  %v2163_v1 = vpop.f32.mrb[143].mxu1 }
 0x234   :  { %v2178_v29 = vmax.f32 %v2044_v26, 0.0  ;;  %2232 = vst [vmem:[%s4809_s3 + $0xe0] sm:$0xff] %v2200_v33  ;;  %v2904_v31 = vadd.f32 %v1823_v53, %v1149_v46  ;;  %v1825_v3 = vpop.f32.mrb[15].mxu0  ;;  %v2164_v59 = vadd.f32 %v4675_v40, %v2163_v1 }
 0x235   :  { %v2203_v9 = vmax.f32 %v2169_v38, 0.0 }
 0x236   :  { %2210 = vst [vmem:[%s4809_s3 + $0x30] sm:$0xff] %v2178_v29  ;;  %v2049_v60 = vadd.f32 %v2904_v31, %v4632_v55  ;;  %v2202_v12 = vmax.f32 %v2164_v59, 0.0 }
 0x237   :  { %2235 = vst [vmem:[%s4809_s3 + $0xf8] sm:$0xff] %v2203_v9 }
 0x238   :  { %v2179_v36 = vmax.f32 %v2049_v60, 0.0  ;;  %2234 = vst [vmem:[%s4809_s3 + $0xf0] sm:$0xff] %v2202_v12 }
 0x23a   :  { %2211 = vst [vmem:[%s4809_s3 + $0x38] sm:$0xff] %v2179_v36 }

</bundles_post_ra>
